<compile_context>
chip_gen: v7x
topology: tpu7x:2x2x1
jax: 0.10.0
libtpu: 0.0.40
codegen_flags: <defaults>
</compile_context>

<pallas_src>
import jax
import jax.numpy as jnp
from jax.experimental import pallas as pl
from jax.experimental.pallas import tpu as pltpu


def _round_up(x, m):
    return ((x + m - 1) // m) * m


# ----------------------------------------------------------------------------
# Pallas kernel: in-kernel one-hot gathers + chained (add -> L2 normalize)
#                stages + fused (normalize . linear) + sigmoid.  Layout (D,TB).
# ----------------------------------------------------------------------------
def _naics_kernel(idx_ref, t2_ref, d3_ref, d4_ref, d5_ref, d6_ref,
                  w_ref, b_ref, out_ref):
    tb = out_ref.shape[-1]
    tables = (t2_ref, d3_ref, d4_ref, d5_ref, d6_ref)
    vmax = max(t.shape[1] for t in tables)

    idx = idx_ref[...]                                    # (8, TB) int32; rows 5..7 pad
    # Single hoisted iota shared by all five one-hot builds (perf review #2);
    # per-level sublane slices iota[:v] are tile-aligned (Vp % 128 == 0).
    iota = jax.lax.broadcasted_iota(jnp.int32, (vmax, tb), 0)

    def gather(level, tbl_ref):
        # Exact row gather as a one-hot matmul: rows[:, n] = table[:, idx[level, n]].
        # One-hot is a single bool->f32 cast (perf review #1); values are exactly
        # 0.0/1.0, so the f32 MXU selection reproduces the f32 table rows exactly
        # (parity with the float32 torch model).
        # TODO(synk): benchmark a true lane gather (jnp.take(tbl, idx, axis=1)) for
        # the large-vocab 5/6-digit levels; one-hot kept as guaranteed-lowering path.
        v = tbl_ref.shape[1]
        sel = iota[:v] == idx[level:level + 1, :]              # (V, TB) bool
        return jnp.dot(tbl_ref[...], sel.astype(jnp.float32),
                       preferred_element_type=jnp.float32)     # (Dp, TB) f32

    def l2_normalize(x):
        # F.normalize(x, p=2, dim=embed) == x * rsqrt(max(||x||^2, eps^2)).
        # Full-precision lax.rsqrt (not an approx EUP rsqrt) keeps the 1e-4
        # parity tolerance.
        ss = jnp.sum(x * x, axis=0, keepdims=True)             # (1, TB)
        return x * jax.lax.rsqrt(jnp.maximum(ss, 1e-24))

    # Dropout == identity (eval / training=False).
    e = l2_normalize(gather(0, t2_ref))        # 2-digit
    e = l2_normalize(e + gather(1, d3_ref))    # 3-digit
    e = l2_normalize(e + gather(2, d4_ref))    # 4-digit
    e = l2_normalize(e + gather(3, d5_ref))    # 5-digit
    x = e + gather(4, d6_ref)                  # 6-digit, pre-normalization

    # Final L2 normalize fused with Linear(D -> 1): VPU multiply + sublane
    # reduce (no degenerate MXU matmul).  logits = <x/||x||, w> + b.
    ss = jnp.sum(x * x, axis=0, keepdims=True)
    inv_norm = jax.lax.rsqrt(jnp.maximum(ss, 1e-24))
    logits = jnp.sum(x * w_ref[...], axis=0, keepdims=True) * inv_norm + b_ref[0, 0]
    # Sigmoid via exp + reciprocal (perf review #10); lane-dense (1, TB) store.
    out_ref[...] = pl.reciprocal(1.0 + jnp.exp(-logits))


def naics_forward(idx_list, tables_t, w_col, bias, batch, *, tile_cap=512):
    """Fused NAICS forward.

    idx_list : five (B,) int32 NAICS code index vectors (2..6 digit)
    tables_t : five (Dp, Vp_l) float32 tables (transposed + zero padded)
    w_col    : (Dp, 1) float32 linear weight (zero padded), bias: (1, 1) float32
    returns  : (B, 1) float32 probabilities
    """
    dp = tables_t[0].shape[0]

    # v7x: choose the batch tile so the "parallel" grid has an even (>= 2)
    # number of tiles, so both TensorCores get work even for small batches;
    # cap at tile_cap lanes (sweep {256,512,1024} + spill check if sizes grow).
    tb = min(tile_cap, _round_up(pl.cdiv(batch, 2), 128))
    bp = _round_up(batch, 2 * tb)
    grid = (bp // tb,)

    # Pack the five index vectors into one (8, bp) int32 array so each grid
    # step issues ONE index DMA instead of five (perf review #3).  Rows 5..7
    # are sublane padding.  Padded batch lanes (>= batch) carry index 0 and
    # produce garbage logits which are sliced off below -- keep that slice if
    # out_shape / slicing ever changes.
    idx_mat = jnp.stack([idx.astype(jnp.int32) for idx in idx_list], axis=0)
    idx_mat = jnp.pad(idx_mat, ((0, 3), (0, bp - batch)))

    idx_spec = pl.BlockSpec((8, tb), lambda i: (0, i))
    out_spec = pl.BlockSpec((1, tb), lambda i: (0, i))
    b_spec = pl.BlockSpec(memory_space=pltpu.MemorySpace.SMEM)     # scalar bias

    def resident_spec(shape, single_buffer):
        # Resident operand (constant index_map): single-buffer it when the
        # installed Pallas supports pipeline_mode -- the block never changes,
        # so a second pipeline buffer is pure VMEM waste (v7x 64 MiB headroom).
        idx_map = lambda i: (0,) * len(shape)
        if single_buffer:
            return pl.BlockSpec(shape, idx_map, pipeline_mode=pl.Buffered(1))
        return pl.BlockSpec(shape, idx_map)

    def build(single_buffer):
        in_specs = ([idx_spec]
                    + [resident_spec(t.shape, single_buffer) for t in tables_t]
                    + [resident_spec((dp, 1), single_buffer), b_spec])
        return pl.pallas_call(
            _naics_kernel,
            out_shape=jax.ShapeDtypeStruct((1, bp), jnp.float32),
            grid=grid,
            in_specs=in_specs,
            out_specs=out_spec,
            compiler_params=pltpu.CompilerParams(
                dimension_semantics=("parallel",),     # v7x: shard tiles over 2 TCs
                vmem_limit_bytes=32 * 1024 * 1024,     # fits v7x 64 MiB and v5e/v6e
            ),
        )

    args = (idx_mat, *tables_t, w_col, bias)
    try:
        out = build(True)(*args)
    except Exception:
        # Fallback for Pallas versions that reject pipeline_mode / Buffered(1);
        # identical kernel, default (double) buffering of the tiny residents.
        out = build(False)(*args)

    return out[0, :batch].reshape(batch, 1)


# ----------------------------------------------------------------------------
# Model parameters (deterministic, synthetic) + one-time kernel layout prep
# ----------------------------------------------------------------------------
class NAICSEmbeddingModelPallas:
    def __init__(self, key, nunique, embed_dim):
        self.embed_dim = embed_dim
        keys = jax.random.split(key, 11)
        normal = lambda k, n: jax.random.normal(k, (n, embed_dim), jnp.float32)
        # nn.Embedding-style tables, kept in float32: they are resident in VMEM
        # and DMA'd once per call, so bf16 buys no bandwidth, and f32 keeps exact
        # parity with the float32 torch model (review correctness note).
        self.embedding_2_digit = normal(keys[0], nunique[2])
        # embedding_3..6_digit exist in the torch module but are unused in forward.
        self.embedding_3_digit = normal(keys[1], nunique[3])
        self.embedding_4_digit = normal(keys[2], nunique[4])
        self.embedding_5_digit = normal(keys[3], nunique[5])
        self.embedding_6_digit = normal(keys[4], nunique[6])
        self.delta_embedding_3_digit = normal(keys[5], nunique[3])
        self.delta_embedding_4_digit = normal(keys[6], nunique[4])
        self.delta_embedding_5_digit = normal(keys[7], nunique[5])
        self.delta_embedding_6_digit = normal(keys[8], nunique[6])
        # nn.Linear(D, 1): uniform(-1/sqrt(D), 1/sqrt(D)); float32.
        bound = 1.0 / (embed_dim ** 0.5)
        self.linear_w = jax.random.uniform(keys[9], (embed_dim, 1), jnp.float32, -bound, bound)
        self.linear_b = jax.random.uniform(keys[10], (1, 1), jnp.float32, -bound, bound)

        # One-time layout plumbing: transpose tables to (D, V), zero-pad D to a
        # multiple of 8 (f32 sublanes) and V to a multiple of 128 (lanes).
        # Zero padding is exact: padded rows/cols contribute nothing.  Do NOT
        # pad Dp further to "help" the MXU -- the MXU is not the binding slot.
        dp = _round_up(embed_dim, 8)

        def prep(table):
            v, d = table.shape
            vp = _round_up(v, 128)
            return jnp.zeros((dp, vp), jnp.float32).at[:d, :v].set(table.T)

        self._tables_t = [prep(self.embedding_2_digit),
                          prep(self.delta_embedding_3_digit),
                          prep(self.delta_embedding_4_digit),
                          prep(self.delta_embedding_5_digit),
                          prep(self.delta_embedding_6_digit)]
        self._w_col = jnp.zeros((dp, 1), jnp.float32).at[:embed_dim, :].set(self.linear_w)
        self._bias = self.linear_b.reshape(1, 1)

    def __call__(self, n2, n3, n4, n5, n6):
        return naics_forward([n2, n3, n4, n5, n6], self._tables_t,
                             self._w_col, self._bias, n2.shape[0])


def _reference_forward(model, n2, n3, n4, n5, n6):
    """Pure-JAX float32 reference (F.normalize semantics) for a parity check."""
    def l2n(x):
        nrm = jnp.sqrt(jnp.sum(x * x, axis=-1, keepdims=True))
        return x / jnp.maximum(nrm, 1e-12)

    take = lambda tbl, idx: jnp.take(tbl, idx, axis=0)
    e = l2n(take(model.embedding_2_digit, n2))
    e = l2n(e + take(model.delta_embedding_3_digit, n3))
    e = l2n(e + take(model.delta_embedding_4_digit, n4))
    e = l2n(e + take(model.delta_embedding_5_digit, n5))
    e = l2n(e + take(model.delta_embedding_6_digit, n6))
    logits = jnp.sum(e * model.linear_w.T, axis=-1, keepdims=True) + model.linear_b
    return jax.nn.sigmoid(logits)


if __name__ == "__main__":
    key = jax.random.PRNGKey(0)
    k_model, k2, k3, k4, k5, k6 = jax.random.split(key, 6)

    # Small synthetic config (same embed_dim at all levels, as the residual
    # adds and the final Linear require).
    nunique = {2: 20, 3: 40, 4: 60, 5: 80, 6: 100}
    embed_dim = 32
    batch = 8

    model = NAICSEmbeddingModelPallas(k_model, nunique, embed_dim)

    naics_2 = jax.random.randint(k2, (batch,), 0, nunique[2], jnp.int32)
    naics_3 = jax.random.randint(k3, (batch,), 0, nunique[3], jnp.int32)
    naics_4 = jax.random.randint(k4, (batch,), 0, nunique[4], jnp.int32)
    naics_5 = jax.random.randint(k5, (batch,), 0, nunique[5], jnp.int32)
    naics_6 = jax.random.randint(k6, (batch,), 0, nunique[6], jnp.int32)

    out = model(naics_2, naics_3, naics_4, naics_5, naics_6)
    out = jax.block_until_ready(out)

    ref = _reference_forward(model, naics_2, naics_3, naics_4, naics_5, naics_6)
    assert out.shape == (batch, 1)
    assert jnp.allclose(out, ref, atol=1e-4, rtol=1e-4), float(jnp.max(jnp.abs(out - ref)))

    print("KERNEL_OK")
</pallas_src>

<mosaic_0001>
module attributes {stable_mosaic.version = 11 : i64} {
  func.func @_naics_kernel(%arg0: i32, %arg1: memref<8x128xi32, #tpu.memory_space<vmem>>, %arg2: memref<32x128xf32, #tpu.memory_space<vmem>>, %arg3: memref<32x128xf32, #tpu.memory_space<vmem>>, %arg4: memref<32x128xf32, #tpu.memory_space<vmem>>, %arg5: memref<32x128xf32, #tpu.memory_space<vmem>>, %arg6: memref<32x128xf32, #tpu.memory_space<vmem>>, %arg7: memref<32x1xf32, #tpu.memory_space<vmem>>, %arg8: memref<1x1xf32, #tpu.memory_space<smem>>, %arg9: memref<1x128xf32, #tpu.memory_space<vmem>>) attributes {dimension_semantics = [#tpu.dimension_semantics<parallel>], iteration_bounds = array<i64: 2>, scalar_prefetch = 0 : i64, scratch_operands = 0 : i64, tpu.core_type = #tpu.core_type<tc>, window_params = [{transform_indices = @transform_0, window_bounds = array<i64: 8, 128>}, {pipeline_mode = #tpu.pipeline_mode<synchronous>, transform_indices = @transform_1, window_bounds = array<i64: 32, 128>}, {pipeline_mode = #tpu.pipeline_mode<synchronous>, transform_indices = @transform_2, window_bounds = array<i64: 32, 128>}, {pipeline_mode = #tpu.pipeline_mode<synchronous>, transform_indices = @transform_3, window_bounds = array<i64: 32, 128>}, {pipeline_mode = #tpu.pipeline_mode<synchronous>, transform_indices = @transform_4, window_bounds = array<i64: 32, 128>}, {pipeline_mode = #tpu.pipeline_mode<synchronous>, transform_indices = @transform_5, window_bounds = array<i64: 32, 128>}, {pipeline_mode = #tpu.pipeline_mode<synchronous>, transform_indices = @transform_6, window_bounds = array<i64: 32, 1>}, {transform_indices = @transform_7, window_bounds = array<i64: 1, 1>}, {transform_indices = @transform_8, window_bounds = array<i64: 1, 128>}]} {
    %c0 = arith.constant 0 : index
    %c0_0 = arith.constant 0 : index
    %0 = vector.load %arg1[%c0, %c0_0] : memref<8x128xi32, #tpu.memory_space<vmem>>, vector<8x128xi32>
    %1 = tpu.iota {dimensions = array<i32: 0>} : vector<128x128xi32>
    %2 = vector.extract_strided_slice %0 {offsets = [0, 0], sizes = [1, 128], strides = [1, 1]} : vector<8x128xi32> to vector<1x128xi32>
    %3 = vector.broadcast %2 : vector<1x128xi32> to vector<128x128xi32>
    %4 = arith.cmpi eq, %1, %3 : vector<128x128xi32>
    %c0_1 = arith.constant 0 : index
    %c0_2 = arith.constant 0 : index
    %5 = vector.load %arg2[%c0_1, %c0_2] : memref<32x128xf32, #tpu.memory_space<vmem>>, vector<32x128xf32>
    %6 = arith.extui %4 : vector<128x128xi1> to vector<128x128xi32>
    %7 = arith.sitofp %6 : vector<128x128xi32> to vector<128x128xf32>
    %cst = arith.constant dense<0.000000e+00> : vector<32x128xf32>
    %8 = tpu.matmul %5, %7, %cst {dimension_numbers = #tpu.dot_dimension_numbers<[1], [0], [0], [1], [0, 0, 1, 1], [], []>} : vector<32x128xf32>, vector<128x128xf32>, vector<32x128xf32> -> vector<32x128xf32>
    %9 = arith.mulf %8, %8 : vector<32x128xf32>
    %cst_3 = arith.constant dense<0.000000e+00> : vector<128xf32>
    %10 = vector.multi_reduction <add>, %9, %cst_3 [0] : vector<32x128xf32> to vector<128xf32>
    %11 = vector.shape_cast %10 : vector<128xf32> to vector<1x128xf32>
    %cst_4 = arith.constant 1.000000e-24 : f32
    %12 = vector.broadcast %cst_4 : f32 to vector<1x128xf32>
    %13 = arith.maximumf %11, %12 : vector<1x128xf32>
    %14 = math.rsqrt %13 : vector<1x128xf32>
    %15 = vector.broadcast %14 : vector<1x128xf32> to vector<32x128xf32>
    %16 = arith.mulf %8, %15 : vector<32x128xf32>
    %17 = vector.extract_strided_slice %0 {offsets = [1, 0], sizes = [1, 128], strides = [1, 1]} : vector<8x128xi32> to vector<1x128xi32>
    %18 = vector.broadcast %17 : vector<1x128xi32> to vector<128x128xi32>
    %19 = arith.cmpi eq, %1, %18 : vector<128x128xi32>
    %c0_5 = arith.constant 0 : index
    %c0_6 = arith.constant 0 : index
    %20 = vector.load %arg3[%c0_5, %c0_6] : memref<32x128xf32, #tpu.memory_space<vmem>>, vector<32x128xf32>
    %21 = arith.extui %19 : vector<128x128xi1> to vector<128x128xi32>
    %22 = arith.sitofp %21 : vector<128x128xi32> to vector<128x128xf32>
    %cst_7 = arith.constant dense<0.000000e+00> : vector<32x128xf32>
    %23 = tpu.matmul %20, %22, %cst_7 {dimension_numbers = #tpu.dot_dimension_numbers<[1], [0], [0], [1], [0, 0, 1, 1], [], []>} : vector<32x128xf32>, vector<128x128xf32>, vector<32x128xf32> -> vector<32x128xf32>
    %24 = arith.addf %16, %23 : vector<32x128xf32>
    %25 = arith.mulf %24, %24 : vector<32x128xf32>
    %cst_8 = arith.constant dense<0.000000e+00> : vector<128xf32>
    %26 = vector.multi_reduction <add>, %25, %cst_8 [0] : vector<32x128xf32> to vector<128xf32>
    %27 = vector.shape_cast %26 : vector<128xf32> to vector<1x128xf32>
    %cst_9 = arith.constant 1.000000e-24 : f32
    %28 = vector.broadcast %cst_9 : f32 to vector<1x128xf32>
    %29 = arith.maximumf %27, %28 : vector<1x128xf32>
    %30 = math.rsqrt %29 : vector<1x128xf32>
    %31 = vector.broadcast %30 : vector<1x128xf32> to vector<32x128xf32>
    %32 = arith.mulf %24, %31 : vector<32x128xf32>
    %33 = vector.extract_strided_slice %0 {offsets = [2, 0], sizes = [1, 128], strides = [1, 1]} : vector<8x128xi32> to vector<1x128xi32>
    %34 = vector.broadcast %33 : vector<1x128xi32> to vector<128x128xi32>
    %35 = arith.cmpi eq, %1, %34 : vector<128x128xi32>
    %c0_10 = arith.constant 0 : index
    %c0_11 = arith.constant 0 : index
    %36 = vector.load %arg4[%c0_10, %c0_11] : memref<32x128xf32, #tpu.memory_space<vmem>>, vector<32x128xf32>
    %37 = arith.extui %35 : vector<128x128xi1> to vector<128x128xi32>
    %38 = arith.sitofp %37 : vector<128x128xi32> to vector<128x128xf32>
    %cst_12 = arith.constant dense<0.000000e+00> : vector<32x128xf32>
    %39 = tpu.matmul %36, %38, %cst_12 {dimension_numbers = #tpu.dot_dimension_numbers<[1], [0], [0], [1], [0, 0, 1, 1], [], []>} : vector<32x128xf32>, vector<128x128xf32>, vector<32x128xf32> -> vector<32x128xf32>
    %40 = arith.addf %32, %39 : vector<32x128xf32>
    %41 = arith.mulf %40, %40 : vector<32x128xf32>
    %cst_13 = arith.constant dense<0.000000e+00> : vector<128xf32>
    %42 = vector.multi_reduction <add>, %41, %cst_13 [0] : vector<32x128xf32> to vector<128xf32>
    %43 = vector.shape_cast %42 : vector<128xf32> to vector<1x128xf32>
    %cst_14 = arith.constant 1.000000e-24 : f32
    %44 = vector.broadcast %cst_14 : f32 to vector<1x128xf32>
    %45 = arith.maximumf %43, %44 : vector<1x128xf32>
    %46 = math.rsqrt %45 : vector<1x128xf32>
    %47 = vector.broadcast %46 : vector<1x128xf32> to vector<32x128xf32>
    %48 = arith.mulf %40, %47 : vector<32x128xf32>
    %49 = vector.extract_strided_slice %0 {offsets = [3, 0], sizes = [1, 128], strides = [1, 1]} : vector<8x128xi32> to vector<1x128xi32>
    %50 = vector.broadcast %49 : vector<1x128xi32> to vector<128x128xi32>
    %51 = arith.cmpi eq, %1, %50 : vector<128x128xi32>
    %c0_15 = arith.constant 0 : index
    %c0_16 = arith.constant 0 : index
    %52 = vector.load %arg5[%c0_15, %c0_16] : memref<32x128xf32, #tpu.memory_space<vmem>>, vector<32x128xf32>
    %53 = arith.extui %51 : vector<128x128xi1> to vector<128x128xi32>
    %54 = arith.sitofp %53 : vector<128x128xi32> to vector<128x128xf32>
    %cst_17 = arith.constant dense<0.000000e+00> : vector<32x128xf32>
    %55 = tpu.matmul %52, %54, %cst_17 {dimension_numbers = #tpu.dot_dimension_numbers<[1], [0], [0], [1], [0, 0, 1, 1], [], []>} : vector<32x128xf32>, vector<128x128xf32>, vector<32x128xf32> -> vector<32x128xf32>
    %56 = arith.addf %48, %55 : vector<32x128xf32>
    %57 = arith.mulf %56, %56 : vector<32x128xf32>
    %cst_18 = arith.constant dense<0.000000e+00> : vector<128xf32>
    %58 = vector.multi_reduction <add>, %57, %cst_18 [0] : vector<32x128xf32> to vector<128xf32>
    %59 = vector.shape_cast %58 : vector<128xf32> to vector<1x128xf32>
    %cst_19 = arith.constant 1.000000e-24 : f32
    %60 = vector.broadcast %cst_19 : f32 to vector<1x128xf32>
    %61 = arith.maximumf %59, %60 : vector<1x128xf32>
    %62 = math.rsqrt %61 : vector<1x128xf32>
    %63 = vector.broadcast %62 : vector<1x128xf32> to vector<32x128xf32>
    %64 = arith.mulf %56, %63 : vector<32x128xf32>
    %65 = vector.extract_strided_slice %0 {offsets = [4, 0], sizes = [1, 128], strides = [1, 1]} : vector<8x128xi32> to vector<1x128xi32>
    %66 = vector.broadcast %65 : vector<1x128xi32> to vector<128x128xi32>
    %67 = arith.cmpi eq, %1, %66 : vector<128x128xi32>
    %c0_20 = arith.constant 0 : index
    %c0_21 = arith.constant 0 : index
    %68 = vector.load %arg6[%c0_20, %c0_21] : memref<32x128xf32, #tpu.memory_space<vmem>>, vector<32x128xf32>
    %69 = arith.extui %67 : vector<128x128xi1> to vector<128x128xi32>
    %70 = arith.sitofp %69 : vector<128x128xi32> to vector<128x128xf32>
    %cst_22 = arith.constant dense<0.000000e+00> : vector<32x128xf32>
    %71 = tpu.matmul %68, %70, %cst_22 {dimension_numbers = #tpu.dot_dimension_numbers<[1], [0], [0], [1], [0, 0, 1, 1], [], []>} : vector<32x128xf32>, vector<128x128xf32>, vector<32x128xf32> -> vector<32x128xf32>
    %72 = arith.addf %64, %71 : vector<32x128xf32>
    %73 = arith.mulf %72, %72 : vector<32x128xf32>
    %cst_23 = arith.constant dense<0.000000e+00> : vector<128xf32>
    %74 = vector.multi_reduction <add>, %73, %cst_23 [0] : vector<32x128xf32> to vector<128xf32>
    %75 = vector.shape_cast %74 : vector<128xf32> to vector<1x128xf32>
    %cst_24 = arith.constant 1.000000e-24 : f32
    %76 = vector.broadcast %cst_24 : f32 to vector<1x128xf32>
    %77 = arith.maximumf %75, %76 : vector<1x128xf32>
    %78 = math.rsqrt %77 : vector<1x128xf32>
    %c0_25 = arith.constant 0 : index
    %c0_26 = arith.constant 0 : index
    %79 = vector.load %arg7[%c0_25, %c0_26] : memref<32x1xf32, #tpu.memory_space<vmem>>, vector<32x1xf32>
    %80 = vector.broadcast %79 : vector<32x1xf32> to vector<32x128xf32>
    %81 = arith.mulf %72, %80 : vector<32x128xf32>
    %cst_27 = arith.constant dense<0.000000e+00> : vector<128xf32>
    %82 = vector.multi_reduction <add>, %81, %cst_27 [0] : vector<32x128xf32> to vector<128xf32>
    %83 = vector.shape_cast %82 : vector<128xf32> to vector<1x128xf32>
    %84 = arith.mulf %83, %78 : vector<1x128xf32>
    %c0_28 = arith.constant 0 : index
    %c0_29 = arith.constant 0 : index
    %85 = memref.load %arg8[%c0_28, %c0_29] : memref<1x1xf32, #tpu.memory_space<smem>>
    %86 = vector.broadcast %85 : f32 to vector<1x128xf32>
    %87 = arith.addf %84, %86 : vector<1x128xf32>
    %cst_30 = arith.constant 0.000000e+00 : f32
    %88 = vector.broadcast %cst_30 : f32 to vector<1x128xf32>
    %89 = arith.subf %88, %87 : vector<1x128xf32>
    %90 = math.exp %89 : vector<1x128xf32>
    %cst_31 = arith.constant 1.000000e+00 : f32
    %91 = vector.broadcast %cst_31 : f32 to vector<1x128xf32>
    %92 = arith.addf %91, %90 : vector<1x128xf32>
    %93 = tpu.reciprocal %92 : vector<1x128xf32> -> vector<1x128xf32>
    %c0_32 = arith.constant 0 : index
    %c0_33 = arith.constant 0 : index
    %94 = vector.load %arg9[%c0_32, %c0_33] : memref<1x128xf32, #tpu.memory_space<vmem>>, vector<1x128xf32>
    tpu.vector_store %arg9[%c0_32, %c0_33], %93 {strides = array<i32>} : memref<1x128xf32, #tpu.memory_space<vmem>>, vector<1x128xf32>,
    return
  }
  func.func @transform_0(%arg0: i32) -> (i32, i32) {
    %c0_i32 = arith.constant 0 : i32
    %c0_i32_0 = arith.constant 0 : i32
    return %c0_i32, %arg0 : i32, i32
  }
  func.func @transform_1(%arg0: i32) -> (i32, i32) {
    %c0_i32 = arith.constant 0 : i32
    %c0_i32_0 = arith.constant 0 : i32
    %c0_i32_1 = arith.constant 0 : i32
    return %c0_i32, %c0_i32_0 : i32, i32
  }
  func.func @transform_2(%arg0: i32) -> (i32, i32) {
    %c0_i32 = arith.constant 0 : i32
    %c0_i32_0 = arith.constant 0 : i32
    %c0_i32_1 = arith.constant 0 : i32
    return %c0_i32, %c0_i32_0 : i32, i32
  }
  func.func @transform_3(%arg0: i32) -> (i32, i32) {
    %c0_i32 = arith.constant 0 : i32
    %c0_i32_0 = arith.constant 0 : i32
    %c0_i32_1 = arith.constant 0 : i32
    return %c0_i32, %c0_i32_0 : i32, i32
  }
  func.func @transform_4(%arg0: i32) -> (i32, i32) {
    %c0_i32 = arith.constant 0 : i32
    %c0_i32_0 = arith.constant 0 : i32
    %c0_i32_1 = arith.constant 0 : i32
    return %c0_i32, %c0_i32_0 : i32, i32
  }
  func.func @transform_5(%arg0: i32) -> (i32, i32) {
    %c0_i32 = arith.constant 0 : i32
    %c0_i32_0 = arith.constant 0 : i32
    %c0_i32_1 = arith.constant 0 : i32
    return %c0_i32, %c0_i32_0 : i32, i32
  }
  func.func @transform_6(%arg0: i32) -> (i32, i32) {
    %c0_i32 = arith.constant 0 : i32
    %c0_i32_0 = arith.constant 0 : i32
    %c0_i32_1 = arith.constant 0 : i32
    return %c0_i32, %c0_i32_0 : i32, i32
  }
  func.func @transform_7(%arg0: i32) -> (i32, i32) {
    %c0_i32 = arith.constant 0 : i32
    %c0_i32_0 = arith.constant 0 : i32
    %c0_i32_1 = arith.constant 0 : i32
    return %c0_i32, %c0_i32_0 : i32, i32
  }
  func.func @transform_8(%arg0: i32) -> (i32, i32) {
    %c0_i32 = arith.constant 0 : i32
    %c0_i32_0 = arith.constant 0 : i32
    return %c0_i32, %arg0 : i32, i32
  }
}

module attributes {stable_mosaic.version = 11 : i64} {
  func.func @_naics_kernel(%arg0: i32, %arg1: memref<8x128xi32, #tpu.memory_space<vmem>>, %arg2: memref<32x128xf32, #tpu.memory_space<vmem>>, %arg3: memref<32x128xf32, #tpu.memory_space<vmem>>, %arg4: memref<32x128xf32, #tpu.memory_space<vmem>>, %arg5: memref<32x128xf32, #tpu.memory_space<vmem>>, %arg6: memref<32x128xf32, #tpu.memory_space<vmem>>, %arg7: memref<32x1xf32, #tpu.memory_space<vmem>>, %arg8: memref<1x1xf32, #tpu.memory_space<smem>>, %arg9: memref<1x128xf32, #tpu.memory_space<vmem>>) attributes {dimension_semantics = [#tpu.dimension_semantics<parallel>], iteration_bounds = array<i64: 2>, scalar_prefetch = 0 : i64, scratch_operands = 0 : i64, tpu.core_type = #tpu.core_type<tc>, window_params = [{transform_indices = @transform_0, window_bounds = array<i64: 8, 128>}, {pipeline_mode = #tpu.pipeline_mode<synchronous>, transform_indices = @transform_1, window_bounds = array<i64: 32, 128>}, {pipeline_mode = #tpu.pipeline_mode<synchronous>, transform_indices = @transform_2, window_bounds = array<i64: 32, 128>}, {pipeline_mode = #tpu.pipeline_mode<synchronous>, transform_indices = @transform_3, window_bounds = array<i64: 32, 128>}, {pipeline_mode = #tpu.pipeline_mode<synchronous>, transform_indices = @transform_4, window_bounds = array<i64: 32, 128>}, {pipeline_mode = #tpu.pipeline_mode<synchronous>, transform_indices = @transform_5, window_bounds = array<i64: 32, 128>}, {pipeline_mode = #tpu.pipeline_mode<synchronous>, transform_indices = @transform_6, window_bounds = array<i64: 32, 1>}, {transform_indices = @transform_7, window_bounds = array<i64: 1, 1>}, {transform_indices = @transform_8, window_bounds = array<i64: 1, 128>}]} {
    %c0 = arith.constant 0 : index
    %c0_0 = arith.constant 0 : index
    %0 = vector.load %arg1[%c0, %c0_0] : memref<8x128xi32, #tpu.memory_space<vmem>>, vector<8x128xi32>
    %1 = tpu.iota {dimensions = array<i32: 0>} : vector<128x128xi32>
    %2 = vector.extract_strided_slice %0 {offsets = [0, 0], sizes = [1, 128], strides = [1, 1]} : vector<8x128xi32> to vector<1x128xi32>
    %3 = vector.broadcast %2 : vector<1x128xi32> to vector<128x128xi32>
    %4 = arith.cmpi eq, %1, %3 : vector<128x128xi32>
    %c0_1 = arith.constant 0 : index
    %c0_2 = arith.constant 0 : index
    %5 = vector.load %arg2[%c0_1, %c0_2] : memref<32x128xf32, #tpu.memory_space<vmem>>, vector<32x128xf32>
    %6 = arith.extui %4 : vector<128x128xi1> to vector<128x128xi32>
    %7 = arith.sitofp %6 : vector<128x128xi32> to vector<128x128xf32>
    %cst = arith.constant dense<0.000000e+00> : vector<32x128xf32>
    %8 = tpu.matmul %5, %7, %cst {dimension_numbers = #tpu.dot_dimension_numbers<[1], [0], [0], [1], [0, 0, 1, 1], [], []>} : vector<32x128xf32>, vector<128x128xf32>, vector<32x128xf32> -> vector<32x128xf32>
    %9 = arith.mulf %8, %8 : vector<32x128xf32>
    %cst_3 = arith.constant dense<0.000000e+00> : vector<128xf32>
    %10 = vector.multi_reduction <add>, %9, %cst_3 [0] : vector<32x128xf32> to vector<128xf32>
    %11 = vector.shape_cast %10 : vector<128xf32> to vector<1x128xf32>
    %cst_4 = arith.constant 1.000000e-24 : f32
    %12 = vector.broadcast %cst_4 : f32 to vector<1x128xf32>
    %13 = arith.maximumf %11, %12 : vector<1x128xf32>
    %14 = math.rsqrt %13 : vector<1x128xf32>
    %15 = vector.broadcast %14 : vector<1x128xf32> to vector<32x128xf32>
    %16 = arith.mulf %8, %15 : vector<32x128xf32>
    %17 = vector.extract_strided_slice %0 {offsets = [1, 0], sizes = [1, 128], strides = [1, 1]} : vector<8x128xi32> to vector<1x128xi32>
    %18 = vector.broadcast %17 : vector<1x128xi32> to vector<128x128xi32>
    %19 = arith.cmpi eq, %1, %18 : vector<128x128xi32>
    %c0_5 = arith.constant 0 : index
    %c0_6 = arith.constant 0 : index
    %20 = vector.load %arg3[%c0_5, %c0_6] : memref<32x128xf32, #tpu.memory_space<vmem>>, vector<32x128xf32>
    %21 = arith.extui %19 : vector<128x128xi1> to vector<128x128xi32>
    %22 = arith.sitofp %21 : vector<128x128xi32> to vector<128x128xf32>
    %cst_7 = arith.constant dense<0.000000e+00> : vector<32x128xf32>
    %23 = tpu.matmul %20, %22, %cst_7 {dimension_numbers = #tpu.dot_dimension_numbers<[1], [0], [0], [1], [0, 0, 1, 1], [], []>} : vector<32x128xf32>, vector<128x128xf32>, vector<32x128xf32> -> vector<32x128xf32>
    %24 = arith.addf %16, %23 : vector<32x128xf32>
    %25 = arith.mulf %24, %24 : vector<32x128xf32>
    %cst_8 = arith.constant dense<0.000000e+00> : vector<128xf32>
    %26 = vector.multi_reduction <add>, %25, %cst_8 [0] : vector<32x128xf32> to vector<128xf32>
    %27 = vector.shape_cast %26 : vector<128xf32> to vector<1x128xf32>
    %cst_9 = arith.constant 1.000000e-24 : f32
    %28 = vector.broadcast %cst_9 : f32 to vector<1x128xf32>
    %29 = arith.maximumf %27, %28 : vector<1x128xf32>
    %30 = math.rsqrt %29 : vector<1x128xf32>
    %31 = vector.broadcast %30 : vector<1x128xf32> to vector<32x128xf32>
    %32 = arith.mulf %24, %31 : vector<32x128xf32>
    %33 = vector.extract_strided_slice %0 {offsets = [2, 0], sizes = [1, 128], strides = [1, 1]} : vector<8x128xi32> to vector<1x128xi32>
    %34 = vector.broadcast %33 : vector<1x128xi32> to vector<128x128xi32>
    %35 = arith.cmpi eq, %1, %34 : vector<128x128xi32>
    %c0_10 = arith.constant 0 : index
    %c0_11 = arith.constant 0 : index
    %36 = vector.load %arg4[%c0_10, %c0_11] : memref<32x128xf32, #tpu.memory_space<vmem>>, vector<32x128xf32>
    %37 = arith.extui %35 : vector<128x128xi1> to vector<128x128xi32>
    %38 = arith.sitofp %37 : vector<128x128xi32> to vector<128x128xf32>
    %cst_12 = arith.constant dense<0.000000e+00> : vector<32x128xf32>
    %39 = tpu.matmul %36, %38, %cst_12 {dimension_numbers = #tpu.dot_dimension_numbers<[1], [0], [0], [1], [0, 0, 1, 1], [], []>} : vector<32x128xf32>, vector<128x128xf32>, vector<32x128xf32> -> vector<32x128xf32>
    %40 = arith.addf %32, %39 : vector<32x128xf32>
    %41 = arith.mulf %40, %40 : vector<32x128xf32>
    %cst_13 = arith.constant dense<0.000000e+00> : vector<128xf32>
    %42 = vector.multi_reduction <add>, %41, %cst_13 [0] : vector<32x128xf32> to vector<128xf32>
    %43 = vector.shape_cast %42 : vector<128xf32> to vector<1x128xf32>
    %cst_14 = arith.constant 1.000000e-24 : f32
    %44 = vector.broadcast %cst_14 : f32 to vector<1x128xf32>
    %45 = arith.maximumf %43, %44 : vector<1x128xf32>
    %46 = math.rsqrt %45 : vector<1x128xf32>
    %47 = vector.broadcast %46 : vector<1x128xf32> to vector<32x128xf32>
    %48 = arith.mulf %40, %47 : vector<32x128xf32>
    %49 = vector.extract_strided_slice %0 {offsets = [3, 0], sizes = [1, 128], strides = [1, 1]} : vector<8x128xi32> to vector<1x128xi32>
    %50 = vector.broadcast %49 : vector<1x128xi32> to vector<128x128xi32>
    %51 = arith.cmpi eq, %1, %50 : vector<128x128xi32>
    %c0_15 = arith.constant 0 : index
    %c0_16 = arith.constant 0 : index
    %52 = vector.load %arg5[%c0_15, %c0_16] : memref<32x128xf32, #tpu.memory_space<vmem>>, vector<32x128xf32>
    %53 = arith.extui %51 : vector<128x128xi1> to vector<128x128xi32>
    %54 = arith.sitofp %53 : vector<128x128xi32> to vector<128x128xf32>
    %cst_17 = arith.constant dense<0.000000e+00> : vector<32x128xf32>
    %55 = tpu.matmul %52, %54, %cst_17 {dimension_numbers = #tpu.dot_dimension_numbers<[1], [0], [0], [1], [0, 0, 1, 1], [], []>} : vector<32x128xf32>, vector<128x128xf32>, vector<32x128xf32> -> vector<32x128xf32>
    %56 = arith.addf %48, %55 : vector<32x128xf32>
    %57 = arith.mulf %56, %56 : vector<32x128xf32>
    %cst_18 = arith.constant dense<0.000000e+00> : vector<128xf32>
    %58 = vector.multi_reduction <add>, %57, %cst_18 [0] : vector<32x128xf32> to vector<128xf32>
    %59 = vector.shape_cast %58 : vector<128xf32> to vector<1x128xf32>
    %cst_19 = arith.constant 1.000000e-24 : f32
    %60 = vector.broadcast %cst_19 : f32 to vector<1x128xf32>
    %61 = arith.maximumf %59, %60 : vector<1x128xf32>
    %62 = math.rsqrt %61 : vector<1x128xf32>
    %63 = vector.broadcast %62 : vector<1x128xf32> to vector<32x128xf32>
    %64 = arith.mulf %56, %63 : vector<32x128xf32>
    %65 = vector.extract_strided_slice %0 {offsets = [4, 0], sizes = [1, 128], strides = [1, 1]} : vector<8x128xi32> to vector<1x128xi32>
    %66 = vector.broadcast %65 : vector<1x128xi32> to vector<128x128xi32>
    %67 = arith.cmpi eq, %1, %66 : vector<128x128xi32>
    %c0_20 = arith.constant 0 : index
    %c0_21 = arith.constant 0 : index
    %68 = vector.load %arg6[%c0_20, %c0_21] : memref<32x128xf32, #tpu.memory_space<vmem>>, vector<32x128xf32>
    %69 = arith.extui %67 : vector<128x128xi1> to vector<128x128xi32>
    %70 = arith.sitofp %69 : vector<128x128xi32> to vector<128x128xf32>
    %cst_22 = arith.constant dense<0.000000e+00> : vector<32x128xf32>
    %71 = tpu.matmul %68, %70, %cst_22 {dimension_numbers = #tpu.dot_dimension_numbers<[1], [0], [0], [1], [0, 0, 1, 1], [], []>} : vector<32x128xf32>, vector<128x128xf32>, vector<32x128xf32> -> vector<32x128xf32>
    %72 = arith.addf %64, %71 : vector<32x128xf32>
    %73 = arith.mulf %72, %72 : vector<32x128xf32>
    %cst_23 = arith.constant dense<0.000000e+00> : vector<128xf32>
    %74 = vector.multi_reduction <add>, %73, %cst_23 [0] : vector<32x128xf32> to vector<128xf32>
    %75 = vector.shape_cast %74 : vector<128xf32> to vector<1x128xf32>
    %cst_24 = arith.constant 1.000000e-24 : f32
    %76 = vector.broadcast %cst_24 : f32 to vector<1x128xf32>
    %77 = arith.maximumf %75, %76 : vector<1x128xf32>
    %78 = math.rsqrt %77 : vector<1x128xf32>
    %c0_25 = arith.constant 0 : index
    %c0_26 = arith.constant 0 : index
    %79 = vector.load %arg7[%c0_25, %c0_26] : memref<32x1xf32, #tpu.memory_space<vmem>>, vector<32x1xf32>
    %80 = vector.broadcast %79 : vector<32x1xf32> to vector<32x128xf32>
    %81 = arith.mulf %72, %80 : vector<32x128xf32>
    %cst_27 = arith.constant dense<0.000000e+00> : vector<128xf32>
    %82 = vector.multi_reduction <add>, %81, %cst_27 [0] : vector<32x128xf32> to vector<128xf32>
    %83 = vector.shape_cast %82 : vector<128xf32> to vector<1x128xf32>
    %84 = arith.mulf %83, %78 : vector<1x128xf32>
    %c0_28 = arith.constant 0 : index
    %c0_29 = arith.constant 0 : index
    %85 = memref.load %arg8[%c0_28, %c0_29] : memref<1x1xf32, #tpu.memory_space<smem>>
    %86 = vector.broadcast %85 : f32 to vector<1x128xf32>
    %87 = arith.addf %84, %86 : vector<1x128xf32>
    %cst_30 = arith.constant 0.000000e+00 : f32
    %88 = vector.broadcast %cst_30 : f32 to vector<1x128xf32>
    %89 = arith.subf %88, %87 : vector<1x128xf32>
    %90 = math.exp %89 : vector<1x128xf32>
    %cst_31 = arith.constant 1.000000e+00 : f32
    %91 = vector.broadcast %cst_31 : f32 to vector<1x128xf32>
    %92 = arith.addf %91, %90 : vector<1x128xf32>
    %93 = tpu.reciprocal %92 : vector<1x128xf32> -> vector<1x128xf32>
    %c0_32 = arith.constant 0 : index
    %c0_33 = arith.constant 0 : index
    %94 = vector.load %arg9[%c0_32, %c0_33] : memref<1x128xf32, #tpu.memory_space<vmem>>, vector<1x128xf32>
    tpu.vector_store %arg9[%c0_32, %c0_33], %93 {strides = array<i32>} : memref<1x128xf32, #tpu.memory_space<vmem>>, vector<1x128xf32>,
    return
  }
  func.func @transform_0(%arg0: i32) -> (i32, i32) {
    %c0_i32 = arith.constant 0 : i32
    %c0_i32_0 = arith.constant 0 : i32
    return %c0_i32, %arg0 : i32, i32
  }
  func.func @transform_1(%arg0: i32) -> (i32, i32) {
    %c0_i32 = arith.constant 0 : i32
    %c0_i32_0 = arith.constant 0 : i32
    %c0_i32_1 = arith.constant 0 : i32
    return %c0_i32, %c0_i32_0 : i32, i32
  }
  func.func @transform_2(%arg0: i32) -> (i32, i32) {
    %c0_i32 = arith.constant 0 : i32
    %c0_i32_0 = arith.constant 0 : i32
    %c0_i32_1 = arith.constant 0 : i32
    return %c0_i32, %c0_i32_0 : i32, i32
  }
  func.func @transform_3(%arg0: i32) -> (i32, i32) {
    %c0_i32 = arith.constant 0 : i32
    %c0_i32_0 = arith.constant 0 : i32
    %c0_i32_1 = arith.constant 0 : i32
    return %c0_i32, %c0_i32_0 : i32, i32
  }
  func.func @transform_4(%arg0: i32) -> (i32, i32) {
    %c0_i32 = arith.constant 0 : i32
    %c0_i32_0 = arith.constant 0 : i32
    %c0_i32_1 = arith.constant 0 : i32
    return %c0_i32, %c0_i32_0 : i32, i32
  }
  func.func @transform_5(%arg0: i32) -> (i32, i32) {
    %c0_i32 = arith.constant 0 : i32
    %c0_i32_0 = arith.constant 0 : i32
    %c0_i32_1 = arith.constant 0 : i32
    return %c0_i32, %c0_i32_0 : i32, i32
  }
  func.func @transform_6(%arg0: i32) -> (i32, i32) {
    %c0_i32 = arith.constant 0 : i32
    %c0_i32_0 = arith.constant 0 : i32
    %c0_i32_1 = arith.constant 0 : i32
    return %c0_i32, %c0_i32_0 : i32, i32
  }
  func.func @transform_7(%arg0: i32) -> (i32, i32) {
    %c0_i32 = arith.constant 0 : i32
    %c0_i32_0 = arith.constant 0 : i32
    %c0_i32_1 = arith.constant 0 : i32
    return %c0_i32, %c0_i32_0 : i32, i32
  }
  func.func @transform_8(%arg0: i32) -> (i32, i32) {
    %c0_i32 = arith.constant 0 : i32
    %c0_i32_0 = arith.constant 0 : i32
    return %c0_i32, %arg0 : i32, i32
  }
}

</mosaic_0001>

<bundles_post_ra>
// kernel: tpu_custom_call.1
= control target key start
LH: loop header
LB: loop body
LE: loop exit
PB: predicated region body
PF: predicated region fallthrough
CT: control target
= control target key end

     0   :  { %s3388_s0 = inlined_call_operand.hbm [shape: s32[8,256], index: 0, kind: input, shape index: {}]   ;;  %s3389_s1 = inlined_call_operand.vmem [shape: f32[32,128], index: 1, kind: input, shape index: {}]   ;;  %s3390_s2 = inlined_call_operand.hbm [shape: f32[32,128], index: 2, kind: input, shape index: {}]   ;;  %s3391_s3 = inlined_call_operand.hbm [shape: f32[32,128], index: 3, kind: input, shape index: {}]   ;;  %s3392_s4 = inlined_call_operand.hbm [shape: f32[32,128], index: 4, kind: input, shape index: {}]   ;;  %s3393_s5 = inlined_call_operand.hbm [shape: f32[32,128], index: 5, kind: input, shape index: {}]   ;;  %s3394_s6 = inlined_call_operand.vmem [shape: f32[32,1], index: 6, kind: input, shape index: {}]   ;;  %s3395_s7 = inlined_call_operand.<no memory space> [shape: f32[1,1], index: 7, kind: input, shape index: {}]   ;;  %s3396_s8 = inlined_call_operand.hbm [shape: f32[1,256], index: 8, kind: output, shape index: {}]  }
   0x1   :  { %13 = sst [smem:[#allocation2]] %s3395_s7 }
   0x2   :  { %14 = vsyncpa [#allocation4], 0 }
   0x3   :  { %16 = vsyncpa [#allocation4 + $0x1], 0 }
   0x4   :  { %17 = vsyncpa [#allocation7], 0 }
   0x5   :  { %18 = vsyncpa [#allocation10], 0 }
   0x6   :  { %19 = vsyncpa [#allocation5], 0 }
   0x7   :  { %21 = vsyncpa [#allocation5 + $0x1], 0  ;;  %s2400_s29 = smov 0   ;;  %s2402_s30 = smov 0  }
   0x8   :  { %s2404_s9 = smov 0   ;;  %s2406_s10 = smov 0  }
   0x9 LB: > { %s2342_s7 = smov [#allocation6]   ;;  %s2421_s12 = sadd.s32 4294967295, %s2340_s10   ;;  %s2340_s10 = sphi %s2406_s10, %s3504_s10   ;;  %s2336_s9 = sphi %s2404_s9, %s3503_s9   ;;  %s2332_s30 = sphi %s2402_s30, %s3502_s30   ;;  %s2328_s29 = sphi %s2400_s29, %s3501_s29  }
   0xa   : > { %s246_s11 = sshll.u32 %s2342_s7, 4  ;;  %p1374_p0 = scmp.ge.s32.totalorder %s2340_s10, 1  ;;  %s2426_s11 = int_to_ptr.vmem [resolvable:$true] %s246_s11 }
   0xb   : > { %p3397_p1 = scmp.eq.s32.totalorder %s2421_s12, 0  ;;  %p231_p2 = scmp.lt.s32.totalorder %s2340_s10, 3 }
   0xc   : > { %s2343_s14 = smov [#allocation9]   ;;  %s2344_s17 = smov [#allocation8]  }
   0xd   : > { %p2428_p3 = pnand %p1374_p0, %p231_p2  ;;  %s272_s15 = sshll.u32 %s2343_s14, 4  ;;  %s2441_s15 = int_to_ptr.vmem [resolvable:$true] %s272_s15 }
   0xe   : > { %s259_s18 = sshll.u32 %s2344_s17, 4  ;;  %s2124_s21 = scalar_lea.hbm %s3390_s2, 512  ;;  %s2443_s18 = int_to_ptr.vmem [resolvable:$true] %s259_s18 }
   0xf   : > { %s3404_s13 = scalar_select %p2428_p3, 1, 0 }
  0x10   : > { %p2037_p5 = pneg %p2428_p3  ;;  %p2125_p7 = scmp.ne.s32.totalorder %s3390_s2, %s2124_s21 }
  0x11   : > { %p2131_p11 = scmp.lt.u32.totalorder %s2124_s21, %s3390_s2 }
  0x12   : > { %p2437_p6 = pnand %p2037_p5, %p3397_p1 }
  0x14   : > { %p2453_p8 = pneg %p2437_p6 }
  0x16   : > { %p2127_p9 = pnand %p2453_p8, %p2125_p7 }
  0x18   : > { %p2128_p10 = pneg %p2127_p9 }
  0x1a   : > { %p2133_p12 = pnand %p2131_p11, %p2128_p10 }
  0x1c   : > { %2136 = shalt.err (!%p2133_p12)
}
  0x1d   : > { %s2137_s27 = scalar_lea.vmem %s2426_s11, 512  ;;  %p2145_p5 = scmp.lt.s32.totalorder %s2426_s11, %s2426_s11 }
  0x1e   : > { %p2138_p13 = scmp.ne.s32.totalorder %s2426_s11, %s2137_s27  ;;  %p2146_p4 = scmp.lt.s32.totalorder %s2137_s27, %s2137_s27 }
  0x20   : > { %p2140_p0 = pnand %p2138_p13, %p2453_p8  ;;  %p2147_p7 = por %p2146_p4, %p2145_p5 }
  0x22   : > { %p2141_p2 = pneg %p2140_p0 }
  0x24   : > { %p2148_p9 = pnand %p2147_p7, %p2141_p2 }
  0x26   : > { %2151 = shalt.err (!%p2148_p9)
}
  0x27   : > { %s2345_s28 = smov 128   ;;  %s2346_s7 = smov 8  }
  0x28   : > { %2040 = dma.hbm_to_vmem [thread:$0]  (!%p2437_p6), %s3390_s2, 512, %s2426_s11, [#allocation7], %s2345_s28, %s2345_s28, %s2346_s7  }
  0x29   : > { %s2152_s21 = scalar_lea.hbm %s3392_s4, 512 }
  0x2a   : > { %p2153_p4 = scmp.ne.s32.totalorder %s3392_s4, %s2152_s21  ;;  %p2159_p12 = scmp.lt.u32.totalorder %s2152_s21, %s3392_s4 }
  0x2c   : > { %p2155_p10 = pnand %p2153_p4, %p2453_p8 }
  0x2e   : > { %p2156_p11 = pneg %p2155_p10 }
  0x30   : > { %p2161_p13 = pnand %p2159_p12, %p2156_p11 }
  0x32   : > { %2164 = shalt.err (!%p2161_p13)
}
  0x33   : > { %s2165_s11 = scalar_lea.vmem %s2441_s15, 512  ;;  %p2173_p7 = scmp.lt.s32.totalorder %s2441_s15, %s2441_s15 }
  0x34   : > { %p2166_p0 = scmp.ne.s32.totalorder %s2441_s15, %s2165_s11  ;;  %p2174_p9 = scmp.lt.s32.totalorder %s2165_s11, %s2165_s11 }
  0x36   : > { %p2168_p2 = pnand %p2166_p0, %p2453_p8  ;;  %p2175_p4 = por %p2174_p9, %p2173_p7 }
  0x38   : > { %p2169_p5 = pneg %p2168_p2 }
  0x3a   : > { %p2176_p10 = pnand %p2175_p4, %p2169_p5 }
  0x3c   : > { %2179 = shalt.err (!%p2176_p10)
}
  0x3d   : > { %2046 = dma.hbm_to_vmem [thread:$0]  (!%p2437_p6), %s3392_s4, 512, %s2441_s15, [#allocation10], %s2345_s28, %s2345_s28, %s2346_s7  }
  0x3e   : > { %s2180_s20 = scalar_lea.hbm %s3391_s3, 512 }
  0x3f   : > { %p2181_p11 = scmp.ne.s32.totalorder %s3391_s3, %s2180_s20  ;;  %p2187_p0 = scmp.lt.u32.totalorder %s2180_s20, %s3391_s3 }
  0x41   : > { %p2183_p12 = pnand %p2181_p11, %p2453_p8 }
  0x43   : > { %p2184_p13 = pneg %p2183_p12 }
  0x45   : > { %p2189_p2 = pnand %p2187_p0, %p2184_p13 }
  0x47   : > { %2192 = shalt.err (!%p2189_p2)
}
  0x48   : > { %s2193_s15 = scalar_lea.vmem %s2443_s18, 512  ;;  %p2201_p4 = scmp.lt.s32.totalorder %s2443_s18, %s2443_s18 }
  0x49   : > { %p2194_p5 = scmp.ne.s32.totalorder %s2443_s18, %s2193_s15  ;;  %p2202_p10 = scmp.lt.s32.totalorder %s2193_s15, %s2193_s15 }
  0x4b   : > { %p2196_p7 = pnand %p2194_p5, %p2453_p8  ;;  %p2203_p11 = por %p2202_p10, %p2201_p4 }
  0x4d   : > { %p2197_p9 = pneg %p2196_p7 }
  0x4f   : > { %p2204_p12 = pnand %p2203_p11, %p2197_p9 }
  0x51   : > { %2207 = shalt.err (!%p2204_p12)
}
  0x52   : > { %2043 = dma.hbm_to_vmem [thread:$0]  (!%p2437_p6), %s3391_s3, 512, %s2443_s18, [#allocation7], %s2345_s28, %s2345_s28, %s2346_s7  }
  0x53   : > { %s2347_s27 = smov [#allocation11]   ;;  %s2208_s20 = scalar_lea.hbm %s3393_s5, 512 }
  0x54   : > { %s285_s14 = sshll.u32 %s2347_s27, 4  ;;  %p2209_p13 = scmp.ne.s32.totalorder %s3393_s5, %s2208_s20  ;;  %s286_s14 = int_to_ptr.vmem [resolvable:$true] %s285_s14 }
  0x55   : > { %p2215_p5 = scmp.lt.u32.totalorder %s2208_s20, %s3393_s5 }
  0x56   : > { %p2211_p0 = pnand %p2209_p13, %p2453_p8 }
  0x58   : > { %p2212_p2 = pneg %p2211_p0 }
  0x5a   : > { %p2217_p7 = pnand %p2215_p5, %p2212_p2 }
  0x5c   : > { %2220 = shalt.err (!%p2217_p7)
}
  0x5d   : > { %s2221_s18 = scalar_lea.vmem %s286_s14, 512  ;;  %p2229_p11 = scmp.lt.s32.totalorder %s286_s14, %s286_s14 }
  0x5e   : > { %p2222_p9 = scmp.ne.s32.totalorder %s286_s14, %s2221_s18  ;;  %p2230_p12 = scmp.lt.s32.totalorder %s2221_s18, %s2221_s18 }
  0x60   : > { %p2224_p4 = pnand %p2222_p9, %p2453_p8  ;;  %p2231_p1 = por %p2230_p12, %p2229_p11 }
  0x62   : > { %p2225_p10 = pneg %p2224_p4 }
  0x64   : > { %p2232_p3 = pnand %p2231_p1, %p2225_p10 }
  0x66   : > { %2235 = shalt.err (!%p2232_p3)
}
  0x67   : > { %2049 = dma.hbm_to_vmem [thread:$0]  (!%p2437_p6), %s3393_s5, 512, %s286_s14, [#allocation10], %s2345_s28, %s2345_s28, %s2346_s7  }
  0x68   : > { %s1373_s16 = sadd.s32 4294967294, %s2340_s10   ;;  %s2552_s24 = sadd.s32 1, %s2340_s10  }
  0x69   : > { %s31_s11 = ssub.s32 %s2340_s10, %s2552_s24  ;;  %s34_s27 = sadd.s32 1, %s2336_s9 }
  0x6a   : > { %p32_p1 = scmp.eq.s32.totalorder %s31_s11, 0  ;;  %p41_p3 = scmp.ne.s32.totalorder %s2336_s9, %s2332_s30 }
  0x6b   : > { %p42_p8 = scmp.eq.s32.totalorder %s2340_s10, 0  ;;  %p47_p13 = scmp.ne.s32.totalorder %s2332_s30, %s2328_s29 }
  0x6c   : > { %s2563_s17 = scalar_select %p32_p1, %s2336_s9, %s34_s27  }
  0x6d   : > { %p2565_p0 = por %p42_p8, %p41_p3  ;;  %p3408_p2 = scmp.eq.s32.totalorder %s2421_s12, 0 }
  0x6e   : > { %p218_p5 = scmp.eq.s32.totalorder %s2421_s12, 1  ;;  %p224_p7 = scmp.eq.s32.totalorder %s1373_s16, 1 }
  0x6f   : > { %p2571_p6 = por %p3408_p2, %p47_p13  ;;  %p2062_p9 = scmp.lt.s32.totalorder %s2340_s10, 2 }
  0x70   : > { %s305_s7 = sand.u32 1, %s2336_s9   ;;  %p2578_p4 = por %p218_p5, %p41_p3 }
  0x71   : > { %p2582_p10 = por %p224_p7, %p47_p13  ;;  %s1380_s21 = sshll.u32 %s305_s7, 3 }
  0x72   : > { %s3410_s14 = scalar_select %p2578_p4, 1, 0 }
  0x73   : > { %s3411_s20 = scalar_select %p2582_p10, 1, 0 }
  0x74   : > { %s1381_s22 = sshll.u32 %s2340_s10, 7  ;;  %s309_s15 = scalar_lea.vmem [#allocation3], %s1380_s21 }
  0x75   : > { %s2590_s18 = scalar_lea.hbm %s3388_s0, %s1381_s22  ;;  %s316_s26 = sshll.u32 %s309_s15, 4  ;;  %s2592_s26 = int_to_ptr.vmem [resolvable:$true] %s316_s26 }
  0x76   : > { %p2596_p11 = pnand %p2062_p9, %p2565_p0  ;;  %s306_s11 = scalar_lea.sflag [#allocation4], %s305_s7 }
  0x77   : > { %s2236_s27 = scalar_lea.hbm %s2590_s18, 128  ;;  %s2241_s23 = scalar_lea.hbm %s3388_s0, 256 }
  0x78   : > { %p2237_p12 = scmp.ne.s32.totalorder %s2590_s18, %s2236_s27  ;;  %p2238_p1 = pneg %p2596_p11 }
  0x79   : > { %p2242_p13 = scmp.lt.u32.totalorder %s2590_s18, %s3388_s0  ;;  %p2243_p0 = scmp.lt.u32.totalorder %s2241_s23, %s2236_s27 }
  0x7a   : > { %p2239_p3 = pnand %p2238_p1, %p2237_p12  ;;  %p2245_p5 = scmp.lt.u32.totalorder %s2236_s27, %s2590_s18 }
  0x7b   : > { %p2244_p2 = por %p2243_p0, %p2242_p13 }
  0x7c   : > { %p2240_p8 = pneg %p2239_p3 }
  0x7d   : > { %p2246_p7 = por %p2245_p5, %p2244_p2 }
  0x7f   : > { %p2247_p9 = pnand %p2246_p7, %p2240_p8 }
  0x81   : > { %2250 = shalt.err (!%p2247_p9)
}
  0x82   : > { %s2251_s7 = scalar_lea.vmem %s2592_s26, 128  ;;  %s2348_s15 = smov [#allocation3]  }
  0x83   : > { %p2252_p12 = scmp.ne.s32.totalorder %s2592_s26, %s2251_s7  ;;  %s2256_s21 = sshll.u32 %s2348_s15, 4  ;;  %s2257_s21 = int_to_ptr.vmem [resolvable:$false] %s2256_s21 }
  0x84   : > { %s2258_s22 = scalar_lea.vmem %s2257_s21, 256  ;;  %p2259_p4 = scmp.lt.s32.totalorder %s2592_s26, %s2257_s21 }
  0x85   : > { %p2254_p3 = pnand %p2252_p12, %p2238_p1  ;;  %p2260_p13 = scmp.lt.s32.totalorder %s2258_s22, %s2251_s7 }
  0x87   : > { %p2255_p10 = pneg %p2254_p3  ;;  %p2261_p0 = por %p2260_p13, %p2259_p4 }
  0x89   : > { %p2262_p2 = pnand %p2261_p0, %p2255_p10 }
  0x8b   : > { %2265 = shalt.err (!%p2262_p2)
}
  0x8c   : > { %2053 = dma.hbm_to_vmem [thread:$0]  (!%p2596_p11), %s2590_s18, 128, %s2592_s26, %s306_s11  }
  0x8d   : > { %p3413_p8 = scmp.ne.s32.totalorder %s3404_s13, 0 }
  0x8e   : > { %s2628_s27 = sand.u32 (!%p3413_p8), 1, %s2332_s30  }
  0x8f   : > { %325 = sbr.rel (%p3413_p8) target bundleno = 641 (0x281), region = 52  ;;  %s1383_s23 = sshll.u32 (!%p3413_p8), %s2628_s27, 3 }
  0x90   : > { %s328_s19 = scalar_lea.sflag (!%p3413_p8), [#allocation4], %s2628_s27  ;;  %s331_s25 = scalar_lea.vmem (!%p3413_p8), [#allocation3], %s1383_s23 }
  0x96   : > { %2311 = dma.done.wait (%p2571_p6), %s328_s19, 128  }
  0x97   : > { %2313 = vsyncadd (%p2571_p6), %s328_s19, 4294967168  ;;  %p3414_p4 = scmp.eq.s32.totalorder %s2421_s12, 0 }
  0x99   : > { %2315 = dma.done.wait (%p3414_p4), [#allocation7], 1024   ;;  %p3415_p10 = pmov %p3414_p4 }
  0x9a   : > { %p3416_p11 = pmov %p3414_p4 }
  0x9b   : > { %2317 = vsyncadd (%p3415_p10), [#allocation7], 4294966272 }
  0x9c   : > { %2319 = dma.done.wait (%p3416_p11), [#allocation10], 1024   ;;  %p3417_p1 = pmov %p3414_p4 }
  0x9d   : > { %v380_v0 = vlaneseq  ;;  %v2656_v6 = vld [vmem:[%s331_s25] sm:$0xff]  ;;  %v577_v12 = vld [vmem:[#allocation6] sm:$0xff]  ;;  %v2349_v15 = vmov 1.0|1.0   ;;  %v420_v52 = vld [vmem:[%s3389_s1 + $0x18] sm:$0xff]  ;;  %v3464_v55 = vmov 0 }
  0x9e   : > { %2321 = vsyncadd (%p3417_p1), [#allocation10], 4294966272  ;;  %v417_v7 = vld [vmem:[%s3389_s1] sm:$0xff]  ;;  %1721 = vmatprep.mubr.f32.mxu1 %v577_v12  ;;  %v418_v46 = vld [vmem:[%s3389_s1 + $0x8] sm:$0xff]  ;;  %v3468_v56 = vmov 0  ;;  %v3472_v57 = vmov 0 }
  0x9f   : > { %v2644_v1 = vshrl.u32 %v380_v0, 7  ;;  %1683 = vmatprep.mubr.f32.mxu0 %v417_v7  ;;  %v419_v48 = vld [vmem:[%s3389_s1 + $0x10] sm:$0xff]  ;;  %v578_v58 = vld [vmem:[#allocation6 + $0x8] sm:$0xff]  ;;  %v579_v60 = vld [vmem:[#allocation6 + $0x10] sm:$0xff]  ;;  %v3480_v61 = vmov 0  ;;  %v2350_v17 = vmov 0  }
  0xa0   : > { %v741_v54 = vld [vmem:[#allocation8] sm:$0xff]  ;;  %v580_v0 = vld [vmem:[#allocation6 + $0x18] sm:$0xff]  ;;  %v743_v7 = vld [vmem:[#allocation8 + $0x10] sm:$0xff]  ;;  %2109 = vset.pattern.permute.xlu1 %v2350_v17  ;;  %2108 = vset.pattern.permute.xlu0 %v2350_v17  ;;  %s1247_s26 = sld [smem:[#allocation2]]  ;;  %s1548_s16 = sshll.u32 %s2421_s12, 4 }
  0xa1   : > { %v399_v2 = vsub.s32 0, %v2644_v1  ;;  %v2648_v3 = vadd.s32 8, %v2644_v1  ;;  %v2651_v4 = vadd.s32 16, %v2644_v1  ;;  %v2654_v5 = vadd.s32 24, %v2644_v1  ;;  %v908_v12 = vld [vmem:[#allocation9 + $0x18] sm:$0xff]  ;;  %v1212_v20 = vld [vmem:[%s3394_s6 + $0x18] sm:$0xff]  ;;  %s3344_s22 = scalar_lea.hbm %s3396_s8, %s1548_s16 }
  0xa2   : > { %v2665_v9 = vadd.s32 32, %v2644_v1  ;;  %v2668_v10 = vadd.s32 40, %v2644_v1  ;;  %v559_v11 = vsub.s32 1, %v2644_v1  ;;  %v2680_v13 = vadd.s32 48, %v2644_v1  ;;  %s378_s11 = scalar_lea.vmem [#allocation12], %s2628_s27  ;;  %s1257_s23 = scalar_lea.sflag [#allocation5], %s2628_s27 }
  0xa3   : > { %v2662_v8 = vrot.slane %v2656_v6, %v399_v2  ;;  %v2683_v14 = vadd.s32 56, %v2644_v1  ;;  %v2704_v18 = vadd.s32 64, %v2644_v1  ;;  %v2707_v19 = vadd.s32 72, %v2644_v1  ;;  %s1269_s7 = sshll.u32 %s378_s11, 4  ;;  %p3498_p5 = scmp.ne.s32.totalorder %s3410_s14, 0  ;;  %s3346_s7 = int_to_ptr.vmem [resolvable:$true] %s1269_s7 }
  0xa4   : > { %v2693_v16 = vrot.slane %v2656_v6, %v559_v11  ;;  %v2730_v21 = vadd.s32 80, %v2644_v1  ;;  %v2733_v22 = vadd.s32 88, %v2644_v1  ;;  %v1051_v24 = vsub.s32 4, %v2644_v1  ;;  %v907_v11 = vld [vmem:[#allocation9 + $0x10] sm:$0xff]  ;;  %s2266_s19 = scalar_lea.vmem %s3346_s7, 16  ;;  %s2351_s12 = smov [#allocation12]  }
  0xa5   : > { %vm401_vm0 = vcmp.eq.s32.totalorder %v2644_v1, %v2662_v8  ;;  %vm402_vm1 = vcmp.eq.s32.totalorder %v2648_v3, %v2662_v8  ;;  %vm403_vm2 = vcmp.eq.s32.totalorder %v2651_v4, %v2662_v8  ;;  %vm404_vm3 = vcmp.eq.s32.totalorder %v2654_v5, %v2662_v8  ;;  %p2267_p6 = scmp.ne.s32.totalorder %s3346_s7, %s2266_s19  ;;  %s2270_s25 = sshll.u32 %s2351_s12, 4  ;;  %s2271_s25 = int_to_ptr.vmem [resolvable:$false] %s2270_s25 }
  0xa6   : > { %vm1841_vm4 = vmpackc.low %vm402_vm1, %vm401_vm0  ;;  %vm405_vm6 = vcmp.eq.s32.totalorder %v2665_v9, %v2662_v8  ;;  %vm406_vm7 = vcmp.eq.s32.totalorder %v2668_v10, %v2662_v8  ;;  %vm407_vm9 = vcmp.eq.s32.totalorder %v2680_v13, %v2662_v8  ;;  %vm408_vm10 = vcmp.eq.s32.totalorder %v2683_v14, %v2662_v8  ;;  %s2272_s13 = scalar_lea.vmem %s2271_s25, 32  ;;  %p2273_p12 = scmp.lt.s32.totalorder %s3346_s7, %s2271_s25 }
  0xa7   : > { %1842 = vmatprep.subr.msk.bf16.mxu0 %vm1841_vm4, %v2349_v15  ;;  %vm1845_vm5 = vmpackc.low %vm404_vm3, %vm403_vm2  ;;  %vm561_vm11 = vcmp.eq.s32.totalorder %v2644_v1, %v2693_v16  ;;  %vm562_vm12 = vcmp.eq.s32.totalorder %v2648_v3, %v2693_v16  ;;  %vm563_vm13 = vcmp.eq.s32.totalorder %v2651_v4, %v2693_v16  ;;  %vm564_vm14 = vcmp.eq.s32.totalorder %v2654_v5, %v2693_v16  ;;  %p2268_p7 = pnand %p2267_p6, %p3498_p5  ;;  %p2274_p3 = scmp.lt.s32.totalorder %s2272_s13, %s2266_s19 }
  0xa8   : > { %1844 = vmatpush3.bf16.msk.msra.mxu0 %vm1841_vm4, %v2349_v15  ;;  %vm2695_vm8 = vmpackc.low %vm406_vm7, %vm405_vm6  ;;  %vm409_vm0 = vcmp.eq.s32.totalorder %v2704_v18, %v2662_v8  ;;  %vm410_vm1 = vcmp.eq.s32.totalorder %v2707_v19, %v2662_v8  ;;  %vm565_vm4 = vcmp.eq.s32.totalorder %v2665_v9, %v2693_v16  ;;  %v2757_v26 = vadd.s32 96, %v2644_v1 }
  0xa9   : > { %1846 = vmatprep.subr.msk.bf16.mxu0 %vm1845_vm5, %v2349_v15  ;;  %vm2721_vm15 = vmpackc.low %vm408_vm10, %vm407_vm9  ;;  %v2760_v27 = vadd.s32 104, %v2644_v1  ;;  %vm411_vm7 = vcmp.eq.s32.totalorder %v2730_v21, %v2662_v8  ;;  %v2770_v28 = vadd.s32 112, %v2644_v1  ;;  %v2773_v29 = vadd.s32 120, %v2644_v1  ;;  %p2269_p9 = pneg %p2268_p7  ;;  %p2275_p13 = por %p2274_p3, %p2273_p12 }
  0xaa   : > { %vm1873_vm2 = vmpackc.low %vm562_vm12, %vm561_vm11  ;;  %vm567_vm10 = vcmp.eq.s32.totalorder %v2680_v13, %v2693_v16  ;;  %vm568_vm11 = vcmp.eq.s32.totalorder %v2683_v14, %v2693_v16  ;;  %v723_v31 = vsub.s32 2, %v2644_v1  ;;  %v2791_v32 = vrot.slane %v2656_v6, %v1051_v24 }
  0xab   : > { %1874 = vmatprep.subr.msk.bf16.mxu1 %vm1873_vm2, %v2349_v15  ;;  %vm2736_vm3 = vmpackc.low %vm564_vm14, %vm563_vm13  ;;  %vm413_vm13 = vcmp.eq.s32.totalorder %v2757_v26, %v2662_v8  ;;  %vm414_vm14 = vcmp.eq.s32.totalorder %v2760_v27, %v2662_v8  ;;  %v887_v37 = vsub.s32 3, %v2644_v1  ;;  %p2276_p0 = pnand %p2275_p13, %p2269_p9 }
  0xac   : > { %1848 = vmatpush3.bf16.msk.msra.mxu0 %vm1845_vm5, %v2349_v15  ;;  %vm566_vm5 = vcmp.eq.s32.totalorder %v2668_v10, %v2693_v16  ;;  %1876 = vmatpush3.bf16.msk.msra.mxu1 %vm1873_vm2, %v2349_v15  ;;  %vm2752_vm6 = vmpackc.low %vm410_vm1, %vm409_vm0  ;;  %vm416_vm0 = vcmp.eq.s32.totalorder %v2773_v29, %v2662_v8  ;;  %vm569_vm2 = vcmp.eq.s32.totalorder %v2704_v18, %v2693_v16 }
  0xad   : > { %1850 = vmatprep.subr.msk.bf16.mxu0 %vm2695_vm8, %v2349_v15  ;;  %1878 = vmatprep.subr.msk.bf16.mxu1 %vm2736_vm3, %v2349_v15  ;;  %vm2775_vm9 = vmpackc.low %vm566_vm5, %vm565_vm4  ;;  %vm571_vm4 = vcmp.eq.s32.totalorder %v2730_v21, %v2693_v16  ;;  %v2822_v35 = vrot.slane %v2656_v6, %v723_v31  ;;  %vm572_vm5 = vcmp.eq.s32.totalorder %v2733_v22, %v2693_v16 }
  0xae   : > { %vm2811_vm1 = vmpackc.low %vm568_vm11, %vm567_vm10  ;;  %v2927_v41 = vrot.slane %v2656_v6, %v887_v37  ;;  %v742_v6 = vld [vmem:[#allocation8 + $0x8] sm:$0xff] }
  0xaf   : > { %vm728_vm11 = vcmp.eq.s32.totalorder %v2654_v5, %v2822_v35 }
  0xb0   : > { %1852 = vmatpush3.bf16.msk.msra.mxu0 %vm2695_vm8, %v2349_v15  ;;  %vm412_vm8 = vcmp.eq.s32.totalorder %v2733_v22, %v2662_v8  ;;  %1880 = vmatpush3.bf16.msk.msra.mxu1 %vm2736_vm3, %v2349_v15  ;;  %vm570_vm3 = vcmp.eq.s32.totalorder %v2707_v19, %v2693_v16  ;;  %vm889_vm10 = vcmp.eq.s32.totalorder %v2644_v1, %v2927_v41 }
  0xb1   : > { %1854 = vmatprep.subr.msk.bf16.mxu0 %vm2721_vm15, %v2349_v15  ;;  %vm2796_vm12 = vmpackc.low %vm412_vm8, %vm411_vm7  ;;  %1882 = vmatprep.subr.msk.bf16.mxu1 %vm2775_vm9, %v2349_v15  ;;  %vm1054_vm7 = vcmp.eq.s32.totalorder %v2648_v3, %v2791_v32  ;;  %vm576_vm8 = vcmp.eq.s32.totalorder %v2773_v29, %v2693_v16 }
  0xb4   : > { %1856 = vmatpush3.bf16.msk.msra.mxu0 %vm2721_vm15, %v2349_v15  ;;  %vm415_vm15 = vcmp.eq.s32.totalorder %v2770_v28, %v2662_v8  ;;  %1884 = vmatpush3.bf16.msk.msra.mxu1 %vm2775_vm9, %v2349_v15  ;;  %vm890_vm9 = vcmp.eq.s32.totalorder %v2648_v3, %v2927_v41  ;;  %v744_v8 = vld [vmem:[#allocation8 + $0x18] sm:$0xff] }
  0xb5   : > { %1858 = vmatprep.subr.msk.bf16.mxu0 %vm2752_vm6, %v2349_v15  ;;  %1886 = vmatprep.subr.msk.bf16.mxu1 %vm2811_vm1, %v2349_v15 }
  0xb8   : > { %1860 = vmatpush3.bf16.msk.msra.mxu0 %vm2752_vm6, %v2349_v15  ;;  %vm2842_vm6 = vmpackc.low %vm414_vm14, %vm413_vm13  ;;  %1888 = vmatpush3.bf16.msk.msra.mxu1 %vm2811_vm1, %v2349_v15  ;;  %vm573_vm1 = vcmp.eq.s32.totalorder %v2757_v26, %v2693_v16  ;;  %vm725_vm14 = vcmp.eq.s32.totalorder %v2644_v1, %v2822_v35 }
  0xb9   : > { %1862 = vmatprep.subr.msk.bf16.mxu0 %vm2796_vm12, %v2349_v15  ;;  %vm2862_vm13 = vmpackc.low %vm570_vm3, %vm569_vm2  ;;  %vm574_vm2 = vcmp.eq.s32.totalorder %v2760_v27, %v2693_v16  ;;  %vm726_vm3 = vcmp.eq.s32.totalorder %v2648_v3, %v2822_v35 }
  0xba   : > { %1890 = vmatprep.subr.msk.bf16.mxu1 %vm2862_vm13, %v2349_v15 }
  0xbc   : > { %1864 = vmatpush3.bf16.msk.msra.mxu0 %vm2796_vm12, %v2349_v15  ;;  %vm2901_vm12 = vmpackc.low %vm416_vm0, %vm415_vm15  ;;  %vm575_vm0 = vcmp.eq.s32.totalorder %v2770_v28, %v2693_v16  ;;  %1892 = vmatpush3.bf16.msk.msra.mxu1 %vm2862_vm13, %v2349_v15  ;;  %vm729_vm13 = vcmp.eq.s32.totalorder %v2665_v9, %v2822_v35  ;;  %v1072_v16 = vld [vmem:[#allocation11 + $0x18] sm:$0xff] }
  0xbd   : > { %1866 = vmatprep.subr.msk.bf16.mxu0 %vm2842_vm6, %v2349_v15  ;;  %vm2918_vm15 = vmpackc.low %vm572_vm5, %vm571_vm4  ;;  %vm727_vm5 = vcmp.eq.s32.totalorder %v2651_v4, %v2822_v35 }
  0xbe   : > { %vm2939_vm4 = vmpackc.low %vm574_vm2, %vm573_vm1  ;;  %1894 = vmatprep.subr.msk.bf16.mxu1 %vm2918_vm15, %v2349_v15  ;;  %vm730_vm2 = vcmp.eq.s32.totalorder %v2668_v10, %v2822_v35 }
  0xbf   : > { %vm2961_vm1 = vmpackc.low %vm726_vm3, %vm725_vm14 }
  0xc0   : > { %1868 = vmatpush3.bf16.msk.msra.mxu0 %vm2842_vm6, %v2349_v15  ;;  %vm2953_vm6 = vmpackc.low %vm576_vm8, %vm575_vm0  ;;  %vm1053_vm0 = vcmp.eq.s32.totalorder %v2644_v1, %v2791_v32  ;;  %1896 = vmatpush3.bf16.msk.msra.mxu1 %vm2918_vm15, %v2349_v15  ;;  %vm3455_vm15 = vcmp.eq.s32.totalorder %v2654_v5, %v2791_v32  ;;  %v905_v1 = vld [vmem:[#allocation9] sm:$0xff] }
  0xc1   : > { %1870 = vmatprep.subr.msk.bf16.mxu0 %vm2901_vm12, %v2349_v15  ;;  %vm2969_vm8 = vmpackc.low %vm728_vm11, %vm727_vm5  ;;  %1898 = vmatprep.subr.msk.bf16.mxu1 %vm2939_vm4, %v2349_v15 }
  0xc2   : > { %vm2984_vm14 = vmpackc.low %vm730_vm2, %vm729_vm13  ;;  %vm3463_vm13 = vcmp.eq.s32.totalorder %v2683_v14, %v2791_v32 }
  0xc3   : > { %vm2997_vm11 = vmpackc.low %vm890_vm9, %vm889_vm10  ;;  %vm3459_vm9 = vcmp.eq.s32.totalorder %v2668_v10, %v2791_v32 }
  0xc4   : > { %1872 = vmatpush3.bf16.msk.msra.mxu0 %vm2901_vm12, %v2349_v15  ;;  %vm3004_vm3 = vmpackc.low %vm1054_vm7, %vm1053_vm0  ;;  %vm3454_vm12 = vcmp.eq.s32.totalorder %v2651_v4, %v2791_v32  ;;  %1900 = vmatpush3.bf16.msk.msra.mxu1 %vm2939_vm4, %v2349_v15  ;;  %vm3458_vm7 = vcmp.eq.s32.totalorder %v2665_v9, %v2791_v32  ;;  %vm3462_vm4 = vcmp.eq.s32.totalorder %v2680_v13, %v2791_v32 }
  0xc5   : > { %1906 = vmatprep.subr.msk.bf16.mxu0 %vm2961_vm1, %v2349_v15  ;;  %vm3014_vm5 = vmpackc.low %vm3455_vm15, %vm3454_vm12  ;;  %1902 = vmatprep.subr.msk.bf16.mxu1 %vm2953_vm6, %v2349_v15  ;;  %vm3466_vm0 = vcmp.eq.s32.totalorder %v2704_v18, %v2791_v32  ;;  %vm891_vm15 = vcmp.eq.s32.totalorder %v2651_v4, %v2927_v41 }
  0xc6   : > { %vm3030_vm10 = vmpackc.low %vm3459_vm9, %vm3458_vm7  ;;  %vm892_vm7 = vcmp.eq.s32.totalorder %v2654_v5, %v2927_v41  ;;  %vm3470_vm9 = vcmp.eq.s32.totalorder %v2730_v21, %v2791_v32 }
  0xc7   : > { %1684 = vmatmul.mubr.f32.vlgmr.msra.gmra.mrb[0].mxu0 %v418_v46  ;;  %vm3046_vm2 = vmpackc.low %vm3463_vm13, %vm3462_vm4  ;;  %vm3471_vm4 = vcmp.eq.s32.totalorder %v2733_v22, %v2791_v32 }
  0xc8   : > { %1686 = vmatprep.mubr.f32.mxu0 %v419_v48  ;;  %1908 = vmatpush3.bf16.msk.msra.mxu0 %vm2961_vm1, %v2349_v15  ;;  %v3465_v55 = vsel %vm3046_vm2, 4294967295, %v3464_v55  ;;  %vm3467_vm1 = vcmp.eq.s32.totalorder %v2707_v19, %v2791_v32  ;;  %vm3073_vm13 = vmpackc.low %vm3471_vm4, %vm3470_vm9  ;;  %vm3475_vm9 = vcmp.eq.s32.totalorder %v2760_v27, %v2791_v32 }
  0xc9   : > { %1910 = vmatprep.subr.msk.bf16.mxu0 %vm2969_vm8, %v2349_v15  ;;  %vm3059_vm12 = vmpackc.low %vm3467_vm1, %vm3466_vm0  ;;  %v3473_v57 = vsel %vm3073_vm13, 4294967295, %v3472_v57  ;;  %1904 = vmatpush3.bf16.msk.msra.mxu1 %vm2953_vm6, %v2349_v15  ;;  %vm731_vm0 = vcmp.eq.s32.totalorder %v2680_v13, %v2822_v35  ;;  %vm732_vm1 = vcmp.eq.s32.totalorder %v2683_v14, %v2822_v35  ;;  %vm3478_vm6 = vcmp.eq.s32.totalorder %v2770_v28, %v2791_v32 }
  0xca   : > { %v3469_v56 = vsel %vm3059_vm12, 4294967295, %v3468_v56  ;;  %vm3474_vm12 = vcmp.eq.s32.totalorder %v2757_v26, %v2791_v32  ;;  %1938 = vmatprep.subr.msk.bf16.mxu1 %vm2997_vm11, %v2349_v15  ;;  %vm3479_vm13 = vcmp.eq.s32.totalorder %v2773_v29, %v2791_v32 }
  0xcb   : > { %1687 = vmatmul.mubr.f32.gmra.mrb[2].mxu0 %v420_v52  ;;  %vm3090_vm4 = vmpackc.low %vm3475_vm9, %vm3474_vm12  ;;  %vm893_vm9 = vcmp.eq.s32.totalorder %v2665_v9, %v2927_v41  ;;  %v1069_v9 = vld [vmem:[#allocation11] sm:$0xff] }
  0xcc   : > { %1759 = vmatprep.mubr.f32.mxu0 %v741_v54  ;;  %1912 = vmatpush3.bf16.msk.msra.mxu0 %vm2969_vm8, %v2349_v15  ;;  %vm3106_vm2 = vmpackc.low %vm3479_vm13, %vm3478_vm6  ;;  %vm894_vm13 = vcmp.eq.s32.totalorder %v2668_v10, %v2927_v41  ;;  %vm733_vm6 = vcmp.eq.s32.totalorder %v2704_v18, %v2822_v35  ;;  %v906_v10 = vld [vmem:[#allocation9 + $0x8] sm:$0xff] }
  0xcd   : > { %v3481_v61 = vsel %vm3106_vm2, 4294967295, %v3480_v61  ;;  %1914 = vmatprep.subr.msk.bf16.mxu0 %vm2984_vm14, %v2349_v15  ;;  %vm3113_vm12 = vmpackc.low %vm892_vm7, %vm891_vm15  ;;  %1722 = vmatmul.mubr.f32.vlgmr.msra.gmra.mrb[0].mxu1 %v578_v58  ;;  %vm734_vm15 = vcmp.eq.s32.totalorder %v2707_v19, %v2822_v35  ;;  %vm738_vm2 = vcmp.eq.s32.totalorder %v2760_v27, %v2822_v35 }
  0xce   : > { %vm3117_vm8 = vmpackc.low %vm732_vm1, %vm731_vm0  ;;  %1724 = vmatprep.mubr.f32.mxu1 %v579_v60  ;;  %1940 = vmatpush3.bf16.msk.msra.mxu1 %vm2997_vm11, %v2349_v15  ;;  %vm896_vm11 = vcmp.eq.s32.totalorder %v2683_v14, %v2927_v41  ;;  %vm735_vm1 = vcmp.eq.s32.totalorder %v2730_v21, %v2822_v35  ;;  %v1070_v14 = vld [vmem:[#allocation11 + $0x8] sm:$0xff] }
  0xcf   : > { %1942 = vmatprep.subr.msk.bf16.mxu1 %vm3113_vm12, %v2349_v15  ;;  %vm3141_vm7 = vmpackc.low %vm894_vm13, %vm893_vm9  ;;  %vm736_vm9 = vcmp.eq.s32.totalorder %v2733_v22, %v2822_v35 }
  0xd0   : > { %1916 = vmatpush3.bf16.msk.msra.mxu0 %vm2984_vm14, %v2349_v15  ;;  %vm3145_vm0 = vmpackc.low %vm734_vm15, %vm733_vm6  ;;  %vm895_vm14 = vcmp.eq.s32.totalorder %v2680_v13, %v2927_v41  ;;  %vm737_vm15 = vcmp.eq.s32.totalorder %v2757_v26, %v2822_v35  ;;  %v1071_v13 = vld [vmem:[#allocation11 + $0x10] sm:$0xff] }
  0xd1   : > { %1918 = vmatprep.subr.msk.bf16.mxu0 %vm3117_vm8, %v2349_v15  ;;  %1725 = vmatmul.mubr.f32.gmra.mrb[2].mxu1 %v580_v0  ;;  %vm3169_vm13 = vmpackc.low %vm896_vm11, %vm895_vm14 }
  0xd2   : > { %1944 = vmatpush3.bf16.msk.msra.mxu1 %vm3113_vm12, %v2349_v15  ;;  %1797 = vmatprep.mubr.f32.mxu1 %v905_v1  ;;  %vm3173_vm6 = vmpackc.low %vm736_vm9, %vm735_vm1  ;;  %vm897_vm12 = vcmp.eq.s32.totalorder %v2704_v18, %v2927_v41  ;;  %vm899_vm1 = vcmp.eq.s32.totalorder %v2730_v21, %v2927_v41  ;;  %vm739_vm9 = vcmp.eq.s32.totalorder %v2770_v28, %v2822_v35  ;;  %v1211_v18 = vld [vmem:[%s3394_s6 + $0x10] sm:$0xff] }
  0xd3   : > { %1946 = vmatprep.subr.msk.bf16.mxu1 %vm3141_vm7, %v2349_v15  ;;  %vm1929_vm11 = vmpackc.low %vm738_vm2, %vm737_vm15  ;;  %vm902_vm15 = vcmp.eq.s32.totalorder %v2760_v27, %v2927_v41  ;;  %1225 = vperm.xlu1 %2109, %v1211_v18  }
  0xd4   : > { %1920 = vmatpush3.bf16.msk.msra.mxu0 %vm3117_vm8, %v2349_v15  ;;  %vm898_vm8 = vcmp.eq.s32.totalorder %v2707_v19, %v2927_v41  ;;  %v1209_v19 = vld [vmem:[%s3394_s6] sm:$0xff] }
  0xd5   : > { %1922 = vmatprep.subr.msk.bf16.mxu0 %vm3145_vm0, %v2349_v15  ;;  %vm1953_vm14 = vmpackc.low %vm898_vm8, %vm897_vm12  ;;  %vm901_vm8 = vcmp.eq.s32.totalorder %v2757_v26, %v2927_v41  ;;  %1215 = vperm.xlu0 %2108, %v1209_v19  }
  0xd6   : > { %1948 = vmatpush3.bf16.msk.msra.mxu1 %vm3141_vm7, %v2349_v15  ;;  %vm900_vm7 = vcmp.eq.s32.totalorder %v2733_v22, %v2927_v41 }
  0xd7   : > { %1950 = vmatprep.subr.msk.bf16.mxu1 %vm3169_vm13, %v2349_v15  ;;  %vm1957_vm2 = vmpackc.low %vm900_vm7, %vm899_vm1  ;;  %vm904_vm1 = vcmp.eq.s32.totalorder %v2773_v29, %v2927_v41  ;;  %1230 = vperm.xlu1 %2109, %v1212_v20  }
  0xd8   : > { %1924 = vmatpush3.bf16.msk.msra.mxu0 %vm3145_vm0, %v2349_v15  ;;  %vm740_vm0 = vcmp.eq.s32.totalorder %v2773_v29, %v2822_v35 }
  0xd9   : > { %1926 = vmatprep.subr.msk.bf16.mxu0 %vm3173_vm6, %v2349_v15  ;;  %vm1933_vm12 = vmpackc.low %vm740_vm0, %vm739_vm9 }
  0xda   : > { %1952 = vmatpush3.bf16.msk.msra.mxu1 %vm3169_vm13, %v2349_v15  ;;  %vm1961_vm13 = vmpackc.low %vm902_vm15, %vm901_vm8 }
  0xdb   : > { %1954 = vmatprep.subr.msk.bf16.mxu1 %vm1953_vm14, %v2349_v15 }
  0xdc   : > { %1928 = vmatpush3.bf16.msk.msra.mxu0 %vm3173_vm6, %v2349_v15  ;;  %vm903_vm6 = vcmp.eq.s32.totalorder %v2770_v28, %v2927_v41 }
  0xdd   : > { %1930 = vmatprep.subr.msk.bf16.mxu0 %vm1929_vm11, %v2349_v15 }
  0xde   : > { %1956 = vmatpush3.bf16.msk.msra.mxu1 %vm1953_vm14, %v2349_v15  ;;  %vm1965_vm14 = vmpackc.low %vm904_vm1, %vm903_vm6 }
  0xdf   : > { %1958 = vmatprep.subr.msk.bf16.mxu1 %vm1957_vm2, %v2349_v15 }
  0xe0   : > { %1932 = vmatpush3.bf16.msk.msra.mxu0 %vm1929_vm11, %v2349_v15  ;;  %vm3494_vm11 = vnez %v3465_v55 }
  0xe1   : > { %1934 = vmatprep.subr.msk.bf16.mxu0 %vm1933_vm12, %v2349_v15 }
  0xe2   : > { %1960 = vmatpush3.bf16.msk.msra.mxu1 %vm1957_vm2, %v2349_v15 }
  0xe3   : > { %1962 = vmatprep.subr.msk.bf16.mxu1 %vm1961_vm13, %v2349_v15 }
  0xe4   : > { %1936 = vmatpush3.bf16.msk.msra.mxu0 %vm1933_vm12, %v2349_v15 }
  0xe5   : > { %1970 = vmatprep.subr.msk.bf16.mxu0 %vm3004_vm3, %v2349_v15 }
  0xe6   : > { %1964 = vmatpush3.bf16.msk.msra.mxu1 %vm1961_vm13, %v2349_v15 }
  0xe7   : > { %1760 = vmatmul.mubr.f32.vlgmr.msra.gmra.mrb[4].mxu0 %v742_v6  ;;  %1966 = vmatprep.subr.msk.bf16.mxu1 %vm1965_vm14, %v2349_v15 }
  0xe8   : > { %1762 = vmatprep.mubr.f32.mxu0 %v743_v7  ;;  %1972 = vmatpush3.bf16.msk.msra.mxu0 %vm3004_vm3, %v2349_v15 }
  0xe9   : > { %1974 = vmatprep.subr.msk.bf16.mxu0 %vm3014_vm5, %v2349_v15 }
  0xea   : > { %1968 = vmatpush3.bf16.msk.msra.mxu1 %vm1965_vm14, %v2349_v15 }
  0xeb   : > { %1763 = vmatmul.mubr.f32.gmra.mrb[6].mxu0 %v744_v8  ;;  %2001 = vmatprep.subr.msk.bf16.mxu1 %vm3004_vm3, %v2349_v15 }
  0xec   : > { %1835 = vmatprep.mubr.f32.mxu0 %v1069_v9  ;;  %1976 = vmatpush3.bf16.msk.msra.mxu0 %vm3014_vm5, %v2349_v15 }
  0xed   : > { %1798 = vmatmul.mubr.f32.vlgmr.msra.gmra.mrb[4].mxu1 %v906_v10  ;;  %1978 = vmatprep.subr.msk.bf16.mxu0 %vm3030_vm10, %v2349_v15 }
  0xee   : > { %1800 = vmatprep.mubr.f32.mxu1 %v907_v11  ;;  %2009 = vmatpush3.bf16.msk.msra.mxu1 %vm3004_vm3, %v2349_v15  ;;  %vm3495_vm3 = vnez %v3469_v56 }
  0xef   : > { %2002 = vmatprep.subr.msk.bf16.mxu1 %vm3014_vm5, %v2349_v15 }
  0xf0   : > { %1980 = vmatpush3.bf16.msk.msra.mxu0 %vm3030_vm10, %v2349_v15 }
  0xf1   : > { %1801 = vmatmul.mubr.f32.gmra.mrb[6].mxu1 %v908_v12  ;;  %1982 = vmatprep.subr.msk.bf16.mxu0 %vm3494_vm11, %v2349_v15 }
  0xf2   : > { %2010 = vmatpush3.bf16.msk.msra.mxu1 %vm3014_vm5, %v2349_v15  ;;  %1838 = vmatprep.mubr.f32.mxu1 %v1071_v13  ;;  %vm3496_vm5 = vnez %v3473_v57 }
  0xf3   : > { %2003 = vmatprep.subr.msk.bf16.mxu1 %vm3030_vm10, %v2349_v15 }
  0xf4   : > { %1984 = vmatpush3.bf16.msk.msra.mxu0 %vm3494_vm11, %v2349_v15 }
  0xf5   : > { %1986 = vmatprep.subr.msk.bf16.mxu0 %vm3495_vm3, %v2349_v15 }
  0xf6   : > { %2011 = vmatpush3.bf16.msk.msra.mxu1 %vm3030_vm10, %v2349_v15  ;;  %vm3497_vm10 = vnez %v3481_v61 }
  0xf7   : > { %2004 = vmatprep.subr.msk.bf16.mxu1 %vm3494_vm11, %v2349_v15 }
  0xf8   : > { %1988 = vmatpush3.bf16.msk.msra.mxu0 %vm3495_vm3, %v2349_v15 }
  0xf9   : > { %1990 = vmatprep.subr.msk.bf16.mxu0 %vm3496_vm5, %v2349_v15 }
  0xfa   : > { %2012 = vmatpush3.bf16.msk.msra.mxu1 %vm3494_vm11, %v2349_v15 }
  0xfb   : > { %2005 = vmatprep.subr.msk.bf16.mxu1 %vm3495_vm3, %v2349_v15 }
  0xfc   : > { %1992 = vmatpush3.bf16.msk.msra.mxu0 %vm3496_vm5, %v2349_v15 }
  0xfd   : > { %1994 = vmatprep.subr.msk.bf16.mxu0 %vm3090_vm4, %v2349_v15 }
  0xfe   : > { %2013 = vmatpush3.bf16.msk.msra.mxu1 %vm3495_vm3, %v2349_v15 }
  0xff   : > { %2006 = vmatprep.subr.msk.bf16.mxu1 %vm3496_vm5, %v2349_v15 }
 0x100   : > { %1996 = vmatpush3.bf16.msk.msra.mxu0 %vm3090_vm4, %v2349_v15 }
 0x101   : > { %1998 = vmatprep.subr.msk.bf16.mxu0 %vm3497_vm10, %v2349_v15 }
 0x102   : > { %2014 = vmatpush3.bf16.msk.msra.mxu1 %vm3496_vm5, %v2349_v15 }
 0x103   : > { %2007 = vmatprep.subr.msk.bf16.mxu1 %vm3090_vm4, %v2349_v15 }
 0x104   : > { %2000 = vmatpush3.bf16.msk.msra.mxu0 %vm3497_vm10, %v2349_v15 }
 0x106   : > { %2015 = vmatpush3.bf16.msk.msra.mxu1 %vm3090_vm4, %v2349_v15 }
 0x107   : > { %2008 = vmatprep.subr.msk.bf16.mxu1 %vm3497_vm10, %v2349_v15  ;;  %1836 = vmatmul.mubr.f32.vlgmr.msra.gmra.mrb[8].mxu0 %v1070_v14 }
 0x10a   : > { %2016 = vmatpush3.bf16.msk.msra.mxu1 %vm3497_vm10, %v2349_v15  ;;  %v1210_v15 = vld [vmem:[%s3394_s6 + $0x8] sm:$0xff] }
 0x10b   : > { %1220 = vperm.xlu0 %2108, %v1210_v15  }
 0x10d   : > { %1839 = vmatmul.mubr.f32.vlgmr.msra.gmra.mrb[8].mxu1 %v1072_v16 }
 0x19a   : > { %v1685_v21 = vpop.f32.mrb[0].mxu0 }
 0x19b   : > { %v539_v22 = vmul.f32 %v1685_v21, %v1685_v21  ;;  %v519_v23 = vpop.f32.mrb[1].mxu0 }
 0x19c   : > { %v538_v24 = vmul.f32 %v519_v23, %v519_v23 }
 0x19e   : > { %v542_v25 = vadd.f32 %v539_v22, %v538_v24  ;;  %v1688_v26 = vpop.f32.mrb[2].mxu0 }
 0x19f   : > { %v529_v27 = vpop.f32.mrb[3].mxu0  ;;  %v541_v29 = vmul.f32 %v1688_v26, %v1688_v26 }
 0x1a0   : > { %v540_v28 = vmul.f32 %v529_v27, %v529_v27  ;;  %v1723_v31 = vpop.f32.mrb[0].mxu1 }
 0x1a1   : > { %v679_v32 = vpop.f32.mrb[1].mxu1 }
 0x1a2   : > { %v543_v30 = vadd.f32 %v542_v25, %v540_v28 }
 0x1a4   : > { %v544_v33 = vadd.f32 %v543_v30, %v541_v29  ;;  %v1726_v35 = vpop.f32.mrb[2].mxu1 }
 0x1a5   : > { %v689_v36 = vpop.f32.mrb[3].mxu1 }
 0x1a6   : > { %v545_v34 = vrot.slane %v544_v33, 4 }
 0x1a8   : > { %v546_v37 = vadd.f32 %v545_v34, %v544_v33 }
 0x1aa   : > { %v547_v38 = vrot.slane %v546_v37, 2 }
 0x1ac   : > { %v548_v39 = vadd.f32 %v547_v38, %v546_v37 }
 0x1ae   : > { %v549_v40 = vrot.slane %v548_v39, 1 }
 0x1b0   : > { %v550_v41 = vadd.f32 %v549_v40, %v548_v39 }
 0x1b2   : > { %v551_v42 = vmax.f32 %v550_v41, 1e-24 }
 0x1b4   : > { %2110 = vrsqrt.f32 %v551_v42 }
 0x1ba   : > { %v1761_v43 = vpop.f32.mrb[4].mxu0 }
 0x1bb   : > { %v843_v44 = vpop.f32.mrb[5].mxu0 }
 0x1be   : > { %v2111_v45 = vpop.eup %2110  ;;  %v1764_v50 = vpop.f32.mrb[6].mxu0 }
 0x1bf   : > { %v555_v46 = vmul.f32 %v2111_v45, %v529_v27  ;;  %v554_v47 = vmul.f32 %v2111_v45, %v1685_v21  ;;  %v553_v48 = vmul.f32 %v2111_v45, %v519_v23  ;;  %v556_v49 = vmul.f32 %v2111_v45, %v1688_v26  ;;  %v853_v51 = vpop.f32.mrb[7].mxu0 }
 0x1c0   : > { %v1799_v56 = vpop.f32.mrb[4].mxu1 }
 0x1c1   : > { %v699_v52 = vadd.f32 %v1723_v31, %v554_v47  ;;  %v698_v53 = vadd.f32 %v679_v32, %v553_v48  ;;  %v701_v54 = vadd.f32 %v1726_v35, %v556_v49  ;;  %v700_v55 = vadd.f32 %v689_v36, %v555_v46  ;;  %v1007_v59 = vpop.f32.mrb[5].mxu1 }
 0x1c3   : > { %v703_v57 = vmul.f32 %v699_v52, %v699_v52  ;;  %v702_v58 = vmul.f32 %v698_v53, %v698_v53  ;;  %v704_v61 = vmul.f32 %v700_v55, %v700_v55  ;;  %v705_v63 = vmul.f32 %v701_v54, %v701_v54 }
 0x1c4   : > { %v1802_v62 = vpop.f32.mrb[6].mxu1 }
 0x1c5   : > { %v706_v60 = vadd.f32 %v703_v57, %v702_v58  ;;  %v1017_v1 = vpop.f32.mrb[7].mxu1 }
 0x1c7   : > { %v707_v0 = vadd.f32 %v706_v60, %v704_v61 }
 0x1c9   : > { %v708_v2 = vadd.f32 %v707_v0, %v705_v63  ;;  %v1216_v63 = vpop.permute.xlu0 %1215 }
 0x1cb   : > { %v709_v3 = vrot.slane %v708_v2, 4 }
 0x1cd   : > { %v710_v4 = vadd.f32 %v709_v3, %v708_v2 }
 0x1cf   : > { %v711_v5 = vrot.slane %v710_v4, 2 }
 0x1d1   : > { %v712_v6 = vadd.f32 %v711_v5, %v710_v4 }
 0x1d3   : > { %v713_v7 = vrot.slane %v712_v6, 1 }
 0x1d5   : > { %v714_v8 = vadd.f32 %v713_v7, %v712_v6  ;;  %v1221_v7 = vpop.permute.xlu0 %1220 }
 0x1d7   : > { %v715_v9 = vmax.f32 %v714_v8, 1e-24 }
 0x1d9   : > { %2112 = vrsqrt.f32 %v715_v9 }
 0x1da   : > { %v1837_v10 = vpop.f32.mrb[8].mxu0 }
 0x1db   : > { %v1171_v11 = vpop.f32.mrb[9].mxu0 }
 0x1e0   : > { %v1840_v12 = vpop.f32.mrb[8].mxu1 }
 0x1e1   : > { %v1181_v14 = vpop.f32.mrb[9].mxu1 }
 0x1e3   : > { %v2113_v13 = vpop.eup %2112 }
 0x1e4   : > { %v718_v16 = vmul.f32 %v2113_v13, %v699_v52  ;;  %v717_v17 = vmul.f32 %v2113_v13, %v698_v53  ;;  %v720_v18 = vmul.f32 %v2113_v13, %v701_v54  ;;  %v719_v19 = vmul.f32 %v2113_v13, %v700_v55 }
 0x1e6   : > { %v863_v20 = vadd.f32 %v1761_v43, %v718_v16  ;;  %v862_v15 = vadd.f32 %v843_v44, %v717_v17  ;;  %v865_v21 = vadd.f32 %v1764_v50, %v720_v18  ;;  %v864_v22 = vadd.f32 %v853_v51, %v719_v19 }
 0x1e8   : > { %v867_v23 = vmul.f32 %v863_v20, %v863_v20  ;;  %v866_v24 = vmul.f32 %v862_v15, %v862_v15  ;;  %v868_v26 = vmul.f32 %v864_v22, %v864_v22  ;;  %v869_v27 = vmul.f32 %v865_v21, %v865_v21 }
 0x1ea   : > { %v870_v25 = vadd.f32 %v867_v23, %v866_v24 }
 0x1ec   : > { %v871_v28 = vadd.f32 %v870_v25, %v868_v26 }
 0x1ee   : > { %v872_v29 = vadd.f32 %v871_v28, %v869_v27 }
 0x1f0   : > { %v873_v30 = vrot.slane %v872_v29, 4 }
 0x1f2   : > { %v874_v31 = vadd.f32 %v873_v30, %v872_v29 }
 0x1f4   : > { %v875_v32 = vrot.slane %v874_v31, 2 }
 0x1f6   : > { %v876_v33 = vadd.f32 %v875_v32, %v874_v31 }
 0x1f8   : > { %v877_v34 = vrot.slane %v876_v33, 1 }
 0x1fa   : > { %v878_v35 = vadd.f32 %v877_v34, %v876_v33 }
 0x1fc   : > { %v879_v36 = vmax.f32 %v878_v35, 1e-24 }
 0x1fe   : > { %2114 = vrsqrt.f32 %v879_v36 }
 0x208   : > { %v2115_v37 = vpop.eup %2114 }
 0x209   : > { %v882_v38 = vmul.f32 %v2115_v37, %v863_v20  ;;  %v881_v39 = vmul.f32 %v2115_v37, %v862_v15  ;;  %v884_v40 = vmul.f32 %v2115_v37, %v865_v21  ;;  %v883_v41 = vmul.f32 %v2115_v37, %v864_v22 }
 0x20a   : > { %v1248_v37 = vstv %s1247_s26 }
 0x20b   : > { %v1027_v42 = vadd.f32 %v1799_v56, %v882_v38  ;;  %v1026_v43 = vadd.f32 %v1007_v59, %v881_v39  ;;  %v1029_v44 = vadd.f32 %v1802_v62, %v884_v40  ;;  %v1028_v45 = vadd.f32 %v1017_v1, %v883_v41  ;;  %v1226_v59 = vpop.permute.xlu1 %1225 }
 0x20d   : > { %v1031_v46 = vmul.f32 %v1027_v42, %v1027_v42  ;;  %v1030_v47 = vmul.f32 %v1026_v43, %v1026_v43  ;;  %v1032_v49 = vmul.f32 %v1028_v45, %v1028_v45  ;;  %v1033_v50 = vmul.f32 %v1029_v44, %v1029_v44 }
 0x20f   : > { %v1034_v48 = vadd.f32 %v1031_v46, %v1030_v47  ;;  %v1231_v19 = vpop.permute.xlu1 %1230 }
 0x211   : > { %v1035_v51 = vadd.f32 %v1034_v48, %v1032_v49 }
 0x213   : > { %v1036_v52 = vadd.f32 %v1035_v51, %v1033_v50 }
 0x215   : > { %v1037_v53 = vrot.slane %v1036_v52, 4 }
 0x217   : > { %v1038_v54 = vadd.f32 %v1037_v53, %v1036_v52 }
 0x219   : > { %v1039_v55 = vrot.slane %v1038_v54, 2 }
 0x21b   : > { %v1040_v57 = vadd.f32 %v1039_v55, %v1038_v54 }
 0x21d   : > { %v1041_v58 = vrot.slane %v1040_v57, 1 }
 0x21f   : > { %v1042_v60 = vadd.f32 %v1041_v58, %v1040_v57 }
 0x221   : > { %v1043_v61 = vmax.f32 %v1042_v60, 1e-24 }
 0x223   : > { %2116 = vrsqrt.f32 %v1043_v61 }
 0x22d   : > { %v2117_v56 = vpop.eup %2116 }
 0x22e   : > { %v1046_v62 = vmul.f32 %v2117_v56, %v1027_v42  ;;  %v1045_v0 = vmul.f32 %v2117_v56, %v1026_v43  ;;  %v1048_v1 = vmul.f32 %v2117_v56, %v1029_v44  ;;  %v1047_v2 = vmul.f32 %v2117_v56, %v1028_v45 }
 0x230   : > { %v1191_v3 = vadd.f32 %v1837_v10, %v1046_v62  ;;  %v1190_v4 = vadd.f32 %v1171_v11, %v1045_v0  ;;  %v1193_v5 = vadd.f32 %v1840_v12, %v1048_v1  ;;  %v1192_v6 = vadd.f32 %v1181_v14, %v1047_v2 }
 0x232   : > { %v1195_v8 = vmul.f32 %v1191_v3, %v1191_v3  ;;  %v1194_v9 = vmul.f32 %v1190_v4, %v1190_v4  ;;  %v1233_v13 = vmul.f32 %v1216_v63, %v1190_v4  ;;  %v1234_v16 = vmul.f32 %v1221_v7, %v1191_v3 }
 0x233   : > { %v1196_v18 = vmul.f32 %v1192_v6, %v1192_v6  ;;  %v1235_v20 = vmul.f32 %v1226_v59, %v1192_v6  ;;  %v1197_v21 = vmul.f32 %v1193_v5, %v1193_v5  ;;  %v1236_v23 = vmul.f32 %v1231_v19, %v1193_v5 }
 0x234   : > { %v1198_v17 = vadd.f32 %v1195_v8, %v1194_v9  ;;  %v1237_v15 = vadd.f32 %v1234_v16, %v1233_v13 }
 0x236   : > { %v1199_v22 = vadd.f32 %v1198_v17, %v1196_v18  ;;  %v1238_v24 = vadd.f32 %v1237_v15, %v1235_v20 }
 0x238   : > { %v1200_v25 = vadd.f32 %v1199_v22, %v1197_v21  ;;  %v1239_v26 = vadd.f32 %v1238_v24, %v1236_v23 }
 0x23a   : > { %v1201_v10 = vrot.slane %v1200_v25, 4  ;;  %v1240_v12 = vrot.slane %v1239_v26, 4 }
 0x23c   : > { %v1202_v11 = vadd.f32 %v1201_v10, %v1200_v25  ;;  %v1241_v28 = vadd.f32 %v1240_v12, %v1239_v26 }
 0x23e   : > { %v1203_v14 = vrot.slane %v1202_v11, 2  ;;  %v1242_v31 = vrot.slane %v1241_v28, 2 }
 0x240   : > { %v1204_v27 = vadd.f32 %v1203_v14, %v1202_v11  ;;  %v1243_v33 = vadd.f32 %v1242_v31, %v1241_v28 }
 0x242   : > { %v1205_v29 = vrot.slane %v1204_v27, 1  ;;  %v1244_v34 = vrot.slane %v1243_v33, 1 }
 0x244   : > { %v1206_v30 = vadd.f32 %v1205_v29, %v1204_v27  ;;  %v1245_v35 = vadd.f32 %v1244_v34, %v1243_v33 }
 0x246   : > { %v1207_v32 = vmax.f32 %v1206_v30, 1e-24 }
 0x248   : > { %2118 = vrsqrt.f32 %v1207_v32 }
 0x252   : > { %v2119_v36 = vpop.eup %2118 }
 0x253   : > { %v1246_v38 = vmul.f32 %v2119_v36, %v1245_v35 }
 0x255   : > { %v1249_v39 = vadd.f32 %v1248_v37, %v1246_v38 }
 0x257   : > { %v1250_v40 = vsub.f32 0.0, %v1249_v39 }
 0x259   : > { %v1251_v41 = vmul.f32 1.442695, %v1250_v40 }
 0x25b   : > { %2120 = vpow2.f32 %v1251_v41 }
 0x265   : > { %v2121_v42 = vpop.eup %2120 }
 0x266   : > { %v1253_v43 = vadd.f32 1.0, %v2121_v42 }
 0x268   : > { %2122 = vrcp.f32 %v1253_v43 }
 0x272   : > { %v2123_v44 = vpop.eup %2122 }
 0x273   : > { %1255 = vst [vmem:[%s378_s11] sm:$0x1] %v2123_v44 }
 0x274   : > { %2279 = shalt.err (!%p2276_p0)
}
 0x275   : > { %s2280_s27 = scalar_lea.hbm %s3344_s22, 16  ;;  %s2284_s26 = scalar_lea.hbm %s3396_s8, 32 }
 0x276   : > { %p2281_p2 = scmp.ne.s32.totalorder %s3344_s22, %s2280_s27  ;;  %p2285_p10 = scmp.lt.u32.totalorder %s3344_s22, %s3396_s8 }
 0x277   : > { %p2286_p11 = scmp.lt.u32.totalorder %s2284_s26, %s2280_s27  ;;  %p2288_p6 = scmp.lt.u32.totalorder %s2280_s27, %s3344_s22 }
 0x278   : > { %p2282_p8 = pnand %p2281_p2, %p3498_p5 }
 0x279   : > { %p2287_p1 = por %p2286_p11, %p2285_p10 }
 0x27a   : > { %p2283_p4 = pneg %p2282_p8 }
 0x27b   : > { %p2289_p7 = por %p2288_p6, %p2287_p1 }
 0x27d   : > { %p2290_p9 = pnand %p2289_p7, %p2283_p4 }
 0x27f   : > { %2293 = shalt.err (!%p2290_p9)
}
 0x280   : > { %2035 = dma.vmem_to_hbm [thread:$0]  (%p3498_p5), %s3346_s7, 16, %s3344_s22, %s1257_s23  }
 0x281 PF: > { %s1281_s15 = sand.u32 1, %s2328_s29   ;;  %p3499_p12 = scmp.ne.s32.totalorder %s3411_s20, 0 }
 0x282   : > { %p3500_p3 = scmp.ge.s32.totalorder %s2340_s10, 2  ;;  %s1282_s21 = scalar_lea.sflag [#allocation5], %s1281_s15 }
 0x284   : > { %p2055_p13 = pnand %p3500_p3, %p3499_p12 }
 0x286   : > { %2323 = dma.done.wait (!%p2055_p13), %s1282_s21, 16  }
 0x287   : > { %2325 = vsyncadd (!%p2055_p13), %s1282_s21, 4294967280  ;;  %p24_p0 = scmp.ge.s32.totalorder %s2552_s24, 4   ;;  %s3501_s29 = smov %s2332_s30 }
 0x288   : > { %s3502_s30 = smov %s2336_s9  ;;  %s3503_s9 = smov %s2563_s17 }
 0x289   : > { %s3504_s10 = smov %s2552_s24  ;;  %26 = sbr.rel (!%p24_p0) target bundleno = 9 (0x9), region = 113 }
 0x290   :  { %1286 = vsyncpa [#allocation4], 1 }
 0x291   :  { %1288 = vsyncpa [#allocation4 + $0x1], 1 }
 0x292   :  { %1289 = vsyncpa [#allocation7], 1 }
 0x293   :  { %1290 = vsyncpa [#allocation10], 1 }
 0x294   :  { %1291 = vsyncpa [#allocation5], 1 }
 0x295   :  { %1293 = vsyncpa [#allocation5 + $0x1], 1 }

// kernel: tpu_custom_call.1
= control target key start
LH: loop header
LB: loop body
LE: loop exit
PB: predicated region body
PF: predicated region fallthrough
CT: control target
= control target key end

     0   :  { %s3388_s0 = inlined_call_operand.hbm [shape: s32[8,256], index: 0, kind: input, shape index: {}]   ;;  %s3389_s1 = inlined_call_operand.vmem [shape: f32[32,128], index: 1, kind: input, shape index: {}]   ;;  %s3390_s2 = inlined_call_operand.hbm [shape: f32[32,128], index: 2, kind: input, shape index: {}]   ;;  %s3391_s3 = inlined_call_operand.hbm [shape: f32[32,128], index: 3, kind: input, shape index: {}]   ;;  %s3392_s4 = inlined_call_operand.hbm [shape: f32[32,128], index: 4, kind: input, shape index: {}]   ;;  %s3393_s5 = inlined_call_operand.hbm [shape: f32[32,128], index: 5, kind: input, shape index: {}]   ;;  %s3394_s6 = inlined_call_operand.vmem [shape: f32[32,1], index: 6, kind: input, shape index: {}]   ;;  %s3395_s7 = inlined_call_operand.<no memory space> [shape: f32[1,1], index: 7, kind: input, shape index: {}]   ;;  %s3396_s8 = inlined_call_operand.hbm [shape: f32[1,256], index: 8, kind: output, shape index: {}]  }
   0x1   :  { %13 = sst [smem:[#allocation2]] %s3395_s7 }
   0x2   :  { %14 = vsyncpa [#allocation4], 0 }
   0x3   :  { %16 = vsyncpa [#allocation4 + $0x1], 0 }
   0x4   :  { %17 = vsyncpa [#allocation7], 0 }
   0x5   :  { %18 = vsyncpa [#allocation10], 0 }
   0x6   :  { %19 = vsyncpa [#allocation5], 0 }
   0x7   :  { %21 = vsyncpa [#allocation5 + $0x1], 0  ;;  %s2400_s29 = smov 0   ;;  %s2402_s30 = smov 0  }
   0x8   :  { %s2404_s9 = smov 0   ;;  %s2406_s10 = smov 0  }
   0x9 LB: > { %s2342_s7 = smov [#allocation6]   ;;  %s2421_s12 = sadd.s32 4294967295, %s2340_s10   ;;  %s2340_s10 = sphi %s2406_s10, %s3504_s10   ;;  %s2336_s9 = sphi %s2404_s9, %s3503_s9   ;;  %s2332_s30 = sphi %s2402_s30, %s3502_s30   ;;  %s2328_s29 = sphi %s2400_s29, %s3501_s29  }
   0xa   : > { %s246_s11 = sshll.u32 %s2342_s7, 4  ;;  %p1374_p0 = scmp.ge.s32.totalorder %s2340_s10, 1  ;;  %s2426_s11 = int_to_ptr.vmem [resolvable:$true] %s246_s11 }
   0xb   : > { %p3397_p1 = scmp.eq.s32.totalorder %s2421_s12, 0  ;;  %p231_p2 = scmp.lt.s32.totalorder %s2340_s10, 3 }
   0xc   : > { %s2343_s14 = smov [#allocation9]   ;;  %s2344_s17 = smov [#allocation8]  }
   0xd   : > { %p2428_p3 = pnand %p1374_p0, %p231_p2  ;;  %s272_s15 = sshll.u32 %s2343_s14, 4  ;;  %s2441_s15 = int_to_ptr.vmem [resolvable:$true] %s272_s15 }
   0xe   : > { %s259_s18 = sshll.u32 %s2344_s17, 4  ;;  %s2124_s21 = scalar_lea.hbm %s3390_s2, 512  ;;  %s2443_s18 = int_to_ptr.vmem [resolvable:$true] %s259_s18 }
   0xf   : > { %s3404_s13 = scalar_select %p2428_p3, 1, 0 }
  0x10   : > { %p2037_p5 = pneg %p2428_p3  ;;  %p2125_p7 = scmp.ne.s32.totalorder %s3390_s2, %s2124_s21 }
  0x11   : > { %p2131_p11 = scmp.lt.u32.totalorder %s2124_s21, %s3390_s2 }
  0x12   : > { %p2437_p6 = pnand %p2037_p5, %p3397_p1 }
  0x14   : > { %p2453_p8 = pneg %p2437_p6 }
  0x16   : > { %p2127_p9 = pnand %p2453_p8, %p2125_p7 }
  0x18   : > { %p2128_p10 = pneg %p2127_p9 }
  0x1a   : > { %p2133_p12 = pnand %p2131_p11, %p2128_p10 }
  0x1c   : > { %2136 = shalt.err (!%p2133_p12)
}
  0x1d   : > { %s2137_s27 = scalar_lea.vmem %s2426_s11, 512  ;;  %p2145_p5 = scmp.lt.s32.totalorder %s2426_s11, %s2426_s11 }
  0x1e   : > { %p2138_p13 = scmp.ne.s32.totalorder %s2426_s11, %s2137_s27  ;;  %p2146_p4 = scmp.lt.s32.totalorder %s2137_s27, %s2137_s27 }
  0x20   : > { %p2140_p0 = pnand %p2138_p13, %p2453_p8  ;;  %p2147_p7 = por %p2146_p4, %p2145_p5 }
  0x22   : > { %p2141_p2 = pneg %p2140_p0 }
  0x24   : > { %p2148_p9 = pnand %p2147_p7, %p2141_p2 }
  0x26   : > { %2151 = shalt.err (!%p2148_p9)
}
  0x27   : > { %s2345_s28 = smov 128   ;;  %s2346_s7 = smov 8  }
  0x28   : > { %2040 = dma.hbm_to_vmem [thread:$0]  (!%p2437_p6), %s3390_s2, 512, %s2426_s11, [#allocation7], %s2345_s28, %s2345_s28, %s2346_s7  }
  0x29   : > { %s2152_s21 = scalar_lea.hbm %s3392_s4, 512 }
  0x2a   : > { %p2153_p4 = scmp.ne.s32.totalorder %s3392_s4, %s2152_s21  ;;  %p2159_p12 = scmp.lt.u32.totalorder %s2152_s21, %s3392_s4 }
  0x2c   : > { %p2155_p10 = pnand %p2153_p4, %p2453_p8 }
  0x2e   : > { %p2156_p11 = pneg %p2155_p10 }
  0x30   : > { %p2161_p13 = pnand %p2159_p12, %p2156_p11 }
  0x32   : > { %2164 = shalt.err (!%p2161_p13)
}
  0x33   : > { %s2165_s11 = scalar_lea.vmem %s2441_s15, 512  ;;  %p2173_p7 = scmp.lt.s32.totalorder %s2441_s15, %s2441_s15 }
  0x34   : > { %p2166_p0 = scmp.ne.s32.totalorder %s2441_s15, %s2165_s11  ;;  %p2174_p9 = scmp.lt.s32.totalorder %s2165_s11, %s2165_s11 }
  0x36   : > { %p2168_p2 = pnand %p2166_p0, %p2453_p8  ;;  %p2175_p4 = por %p2174_p9, %p2173_p7 }
  0x38   : > { %p2169_p5 = pneg %p2168_p2 }
  0x3a   : > { %p2176_p10 = pnand %p2175_p4, %p2169_p5 }
  0x3c   : > { %2179 = shalt.err (!%p2176_p10)
}
  0x3d   : > { %2046 = dma.hbm_to_vmem [thread:$0]  (!%p2437_p6), %s3392_s4, 512, %s2441_s15, [#allocation10], %s2345_s28, %s2345_s28, %s2346_s7  }
  0x3e   : > { %s2180_s20 = scalar_lea.hbm %s3391_s3, 512 }
  0x3f   : > { %p2181_p11 = scmp.ne.s32.totalorder %s3391_s3, %s2180_s20  ;;  %p2187_p0 = scmp.lt.u32.totalorder %s2180_s20, %s3391_s3 }
  0x41   : > { %p2183_p12 = pnand %p2181_p11, %p2453_p8 }
  0x43   : > { %p2184_p13 = pneg %p2183_p12 }
  0x45   : > { %p2189_p2 = pnand %p2187_p0, %p2184_p13 }
  0x47   : > { %2192 = shalt.err (!%p2189_p2)
}
  0x48   : > { %s2193_s15 = scalar_lea.vmem %s2443_s18, 512  ;;  %p2201_p4 = scmp.lt.s32.totalorder %s2443_s18, %s2443_s18 }
  0x49   : > { %p2194_p5 = scmp.ne.s32.totalorder %s2443_s18, %s2193_s15  ;;  %p2202_p10 = scmp.lt.s32.totalorder %s2193_s15, %s2193_s15 }
  0x4b   : > { %p2196_p7 = pnand %p2194_p5, %p2453_p8  ;;  %p2203_p11 = por %p2202_p10, %p2201_p4 }
  0x4d   : > { %p2197_p9 = pneg %p2196_p7 }
  0x4f   : > { %p2204_p12 = pnand %p2203_p11, %p2197_p9 }
  0x51   : > { %2207 = shalt.err (!%p2204_p12)
}
  0x52   : > { %2043 = dma.hbm_to_vmem [thread:$0]  (!%p2437_p6), %s3391_s3, 512, %s2443_s18, [#allocation7], %s2345_s28, %s2345_s28, %s2346_s7  }
  0x53   : > { %s2347_s27 = smov [#allocation11]   ;;  %s2208_s20 = scalar_lea.hbm %s3393_s5, 512 }
  0x54   : > { %s285_s14 = sshll.u32 %s2347_s27, 4  ;;  %p2209_p13 = scmp.ne.s32.totalorder %s3393_s5, %s2208_s20  ;;  %s286_s14 = int_to_ptr.vmem [resolvable:$true] %s285_s14 }
  0x55   : > { %p2215_p5 = scmp.lt.u32.totalorder %s2208_s20, %s3393_s5 }
  0x56   : > { %p2211_p0 = pnand %p2209_p13, %p2453_p8 }
  0x58   : > { %p2212_p2 = pneg %p2211_p0 }
  0x5a   : > { %p2217_p7 = pnand %p2215_p5, %p2212_p2 }
  0x5c   : > { %2220 = shalt.err (!%p2217_p7)
}
  0x5d   : > { %s2221_s18 = scalar_lea.vmem %s286_s14, 512  ;;  %p2229_p11 = scmp.lt.s32.totalorder %s286_s14, %s286_s14 }
  0x5e   : > { %p2222_p9 = scmp.ne.s32.totalorder %s286_s14, %s2221_s18  ;;  %p2230_p12 = scmp.lt.s32.totalorder %s2221_s18, %s2221_s18 }
  0x60   : > { %p2224_p4 = pnand %p2222_p9, %p2453_p8  ;;  %p2231_p1 = por %p2230_p12, %p2229_p11 }
  0x62   : > { %p2225_p10 = pneg %p2224_p4 }
  0x64   : > { %p2232_p3 = pnand %p2231_p1, %p2225_p10 }
  0x66   : > { %2235 = shalt.err (!%p2232_p3)
}
  0x67   : > { %2049 = dma.hbm_to_vmem [thread:$0]  (!%p2437_p6), %s3393_s5, 512, %s286_s14, [#allocation10], %s2345_s28, %s2345_s28, %s2346_s7  }
  0x68   : > { %s1373_s16 = sadd.s32 4294967294, %s2340_s10   ;;  %s2552_s24 = sadd.s32 1, %s2340_s10  }
  0x69   : > { %s31_s11 = ssub.s32 %s2340_s10, %s2552_s24  ;;  %s34_s27 = sadd.s32 1, %s2336_s9 }
  0x6a   : > { %p32_p1 = scmp.eq.s32.totalorder %s31_s11, 0  ;;  %p41_p3 = scmp.ne.s32.totalorder %s2336_s9, %s2332_s30 }
  0x6b   : > { %p42_p8 = scmp.eq.s32.totalorder %s2340_s10, 0  ;;  %p47_p13 = scmp.ne.s32.totalorder %s2332_s30, %s2328_s29 }
  0x6c   : > { %s2563_s17 = scalar_select %p32_p1, %s2336_s9, %s34_s27  }
  0x6d   : > { %p2565_p0 = por %p42_p8, %p41_p3  ;;  %p3408_p2 = scmp.eq.s32.totalorder %s2421_s12, 0 }
  0x6e   : > { %p218_p5 = scmp.eq.s32.totalorder %s2421_s12, 1  ;;  %p224_p7 = scmp.eq.s32.totalorder %s1373_s16, 1 }
  0x6f   : > { %p2571_p6 = por %p3408_p2, %p47_p13  ;;  %p2062_p9 = scmp.lt.s32.totalorder %s2340_s10, 2 }
  0x70   : > { %s305_s7 = sand.u32 1, %s2336_s9   ;;  %p2578_p4 = por %p218_p5, %p41_p3 }
  0x71   : > { %p2582_p10 = por %p224_p7, %p47_p13  ;;  %s1380_s21 = sshll.u32 %s305_s7, 3 }
  0x72   : > { %s3410_s14 = scalar_select %p2578_p4, 1, 0 }
  0x73   : > { %s3411_s20 = scalar_select %p2582_p10, 1, 0 }
  0x74   : > { %s1381_s22 = sshll.u32 %s2340_s10, 7  ;;  %s309_s15 = scalar_lea.vmem [#allocation3], %s1380_s21 }
  0x75   : > { %s2590_s18 = scalar_lea.hbm %s3388_s0, %s1381_s22  ;;  %s316_s26 = sshll.u32 %s309_s15, 4  ;;  %s2592_s26 = int_to_ptr.vmem [resolvable:$true] %s316_s26 }
  0x76   : > { %p2596_p11 = pnand %p2062_p9, %p2565_p0  ;;  %s306_s11 = scalar_lea.sflag [#allocation4], %s305_s7 }
  0x77   : > { %s2236_s27 = scalar_lea.hbm %s2590_s18, 128  ;;  %s2241_s23 = scalar_lea.hbm %s3388_s0, 256 }
  0x78   : > { %p2237_p12 = scmp.ne.s32.totalorder %s2590_s18, %s2236_s27  ;;  %p2238_p1 = pneg %p2596_p11 }
  0x79   : > { %p2242_p13 = scmp.lt.u32.totalorder %s2590_s18, %s3388_s0  ;;  %p2243_p0 = scmp.lt.u32.totalorder %s2241_s23, %s2236_s27 }
  0x7a   : > { %p2239_p3 = pnand %p2238_p1, %p2237_p12  ;;  %p2245_p5 = scmp.lt.u32.totalorder %s2236_s27, %s2590_s18 }
  0x7b   : > { %p2244_p2 = por %p2243_p0, %p2242_p13 }
  0x7c   : > { %p2240_p8 = pneg %p2239_p3 }
  0x7d   : > { %p2246_p7 = por %p2245_p5, %p2244_p2 }
  0x7f   : > { %p2247_p9 = pnand %p2246_p7, %p2240_p8 }
  0x81   : > { %2250 = shalt.err (!%p2247_p9)
}
  0x82   : > { %s2251_s7 = scalar_lea.vmem %s2592_s26, 128  ;;  %s2348_s15 = smov [#allocation3]  }
  0x83   : > { %p2252_p12 = scmp.ne.s32.totalorder %s2592_s26, %s2251_s7  ;;  %s2256_s21 = sshll.u32 %s2348_s15, 4  ;;  %s2257_s21 = int_to_ptr.vmem [resolvable:$false] %s2256_s21 }
  0x84   : > { %s2258_s22 = scalar_lea.vmem %s2257_s21, 256  ;;  %p2259_p4 = scmp.lt.s32.totalorder %s2592_s26, %s2257_s21 }
  0x85   : > { %p2254_p3 = pnand %p2252_p12, %p2238_p1  ;;  %p2260_p13 = scmp.lt.s32.totalorder %s2258_s22, %s2251_s7 }
  0x87   : > { %p2255_p10 = pneg %p2254_p3  ;;  %p2261_p0 = por %p2260_p13, %p2259_p4 }
  0x89   : > { %p2262_p2 = pnand %p2261_p0, %p2255_p10 }
  0x8b   : > { %2265 = shalt.err (!%p2262_p2)
}
  0x8c   : > { %2053 = dma.hbm_to_vmem [thread:$0]  (!%p2596_p11), %s2590_s18, 128, %s2592_s26, %s306_s11  }
  0x8d   : > { %p3413_p8 = scmp.ne.s32.totalorder %s3404_s13, 0 }
  0x8e   : > { %s2628_s27 = sand.u32 (!%p3413_p8), 1, %s2332_s30  }
  0x8f   : > { %325 = sbr.rel (%p3413_p8) target bundleno = 641 (0x281), region = 52  ;;  %s1383_s23 = sshll.u32 (!%p3413_p8), %s2628_s27, 3 }
  0x90   : > { %s328_s19 = scalar_lea.sflag (!%p3413_p8), [#allocation4], %s2628_s27  ;;  %s331_s25 = scalar_lea.vmem (!%p3413_p8), [#allocation3], %s1383_s23 }
  0x96   : > { %2311 = dma.done.wait (%p2571_p6), %s328_s19, 128  }
  0x97   : > { %2313 = vsyncadd (%p2571_p6), %s328_s19, 4294967168  ;;  %p3414_p4 = scmp.eq.s32.totalorder %s2421_s12, 0 }
  0x99   : > { %2315 = dma.done.wait (%p3414_p4), [#allocation7], 1024   ;;  %p3415_p10 = pmov %p3414_p4 }
  0x9a   : > { %p3416_p11 = pmov %p3414_p4 }
  0x9b   : > { %2317 = vsyncadd (%p3415_p10), [#allocation7], 4294966272 }
  0x9c   : > { %2319 = dma.done.wait (%p3416_p11), [#allocation10], 1024   ;;  %p3417_p1 = pmov %p3414_p4 }
  0x9d   : > { %v380_v0 = vlaneseq  ;;  %v2656_v6 = vld [vmem:[%s331_s25] sm:$0xff]  ;;  %v577_v12 = vld [vmem:[#allocation6] sm:$0xff]  ;;  %v2349_v15 = vmov 1.0|1.0   ;;  %v420_v52 = vld [vmem:[%s3389_s1 + $0x18] sm:$0xff]  ;;  %v3464_v55 = vmov 0 }
  0x9e   : > { %2321 = vsyncadd (%p3417_p1), [#allocation10], 4294966272  ;;  %v417_v7 = vld [vmem:[%s3389_s1] sm:$0xff]  ;;  %1721 = vmatprep.mubr.f32.mxu1 %v577_v12  ;;  %v418_v46 = vld [vmem:[%s3389_s1 + $0x8] sm:$0xff]  ;;  %v3468_v56 = vmov 0  ;;  %v3472_v57 = vmov 0 }
  0x9f   : > { %v2644_v1 = vshrl.u32 %v380_v0, 7  ;;  %1683 = vmatprep.mubr.f32.mxu0 %v417_v7  ;;  %v419_v48 = vld [vmem:[%s3389_s1 + $0x10] sm:$0xff]  ;;  %v578_v58 = vld [vmem:[#allocation6 + $0x8] sm:$0xff]  ;;  %v579_v60 = vld [vmem:[#allocation6 + $0x10] sm:$0xff]  ;;  %v3480_v61 = vmov 0  ;;  %v2350_v17 = vmov 0  }
  0xa0   : > { %v741_v54 = vld [vmem:[#allocation8] sm:$0xff]  ;;  %v580_v0 = vld [vmem:[#allocation6 + $0x18] sm:$0xff]  ;;  %v743_v7 = vld [vmem:[#allocation8 + $0x10] sm:$0xff]  ;;  %2109 = vset.pattern.permute.xlu1 %v2350_v17  ;;  %2108 = vset.pattern.permute.xlu0 %v2350_v17  ;;  %s1247_s26 = sld [smem:[#allocation2]]  ;;  %s1548_s16 = sshll.u32 %s2421_s12, 4 }
  0xa1   : > { %v399_v2 = vsub.s32 0, %v2644_v1  ;;  %v2648_v3 = vadd.s32 8, %v2644_v1  ;;  %v2651_v4 = vadd.s32 16, %v2644_v1  ;;  %v2654_v5 = vadd.s32 24, %v2644_v1  ;;  %v908_v12 = vld [vmem:[#allocation9 + $0x18] sm:$0xff]  ;;  %v1212_v20 = vld [vmem:[%s3394_s6 + $0x18] sm:$0xff]  ;;  %s3344_s22 = scalar_lea.hbm %s3396_s8, %s1548_s16 }
  0xa2   : > { %v2665_v9 = vadd.s32 32, %v2644_v1  ;;  %v2668_v10 = vadd.s32 40, %v2644_v1  ;;  %v559_v11 = vsub.s32 1, %v2644_v1  ;;  %v2680_v13 = vadd.s32 48, %v2644_v1  ;;  %s378_s11 = scalar_lea.vmem [#allocation12], %s2628_s27  ;;  %s1257_s23 = scalar_lea.sflag [#allocation5], %s2628_s27 }
  0xa3   : > { %v2662_v8 = vrot.slane %v2656_v6, %v399_v2  ;;  %v2683_v14 = vadd.s32 56, %v2644_v1  ;;  %v2704_v18 = vadd.s32 64, %v2644_v1  ;;  %v2707_v19 = vadd.s32 72, %v2644_v1  ;;  %s1269_s7 = sshll.u32 %s378_s11, 4  ;;  %p3498_p5 = scmp.ne.s32.totalorder %s3410_s14, 0  ;;  %s3346_s7 = int_to_ptr.vmem [resolvable:$true] %s1269_s7 }
  0xa4   : > { %v2693_v16 = vrot.slane %v2656_v6, %v559_v11  ;;  %v2730_v21 = vadd.s32 80, %v2644_v1  ;;  %v2733_v22 = vadd.s32 88, %v2644_v1  ;;  %v1051_v24 = vsub.s32 4, %v2644_v1  ;;  %v907_v11 = vld [vmem:[#allocation9 + $0x10] sm:$0xff]  ;;  %s2266_s19 = scalar_lea.vmem %s3346_s7, 16  ;;  %s2351_s12 = smov [#allocation12]  }
  0xa5   : > { %vm401_vm0 = vcmp.eq.s32.totalorder %v2644_v1, %v2662_v8  ;;  %vm402_vm1 = vcmp.eq.s32.totalorder %v2648_v3, %v2662_v8  ;;  %vm403_vm2 = vcmp.eq.s32.totalorder %v2651_v4, %v2662_v8  ;;  %vm404_vm3 = vcmp.eq.s32.totalorder %v2654_v5, %v2662_v8  ;;  %p2267_p6 = scmp.ne.s32.totalorder %s3346_s7, %s2266_s19  ;;  %s2270_s25 = sshll.u32 %s2351_s12, 4  ;;  %s2271_s25 = int_to_ptr.vmem [resolvable:$false] %s2270_s25 }
  0xa6   : > { %vm1841_vm4 = vmpackc.low %vm402_vm1, %vm401_vm0  ;;  %vm405_vm6 = vcmp.eq.s32.totalorder %v2665_v9, %v2662_v8  ;;  %vm406_vm7 = vcmp.eq.s32.totalorder %v2668_v10, %v2662_v8  ;;  %vm407_vm9 = vcmp.eq.s32.totalorder %v2680_v13, %v2662_v8  ;;  %vm408_vm10 = vcmp.eq.s32.totalorder %v2683_v14, %v2662_v8  ;;  %s2272_s13 = scalar_lea.vmem %s2271_s25, 32  ;;  %p2273_p12 = scmp.lt.s32.totalorder %s3346_s7, %s2271_s25 }
  0xa7   : > { %1842 = vmatprep.subr.msk.bf16.mxu0 %vm1841_vm4, %v2349_v15  ;;  %vm1845_vm5 = vmpackc.low %vm404_vm3, %vm403_vm2  ;;  %vm561_vm11 = vcmp.eq.s32.totalorder %v2644_v1, %v2693_v16  ;;  %vm562_vm12 = vcmp.eq.s32.totalorder %v2648_v3, %v2693_v16  ;;  %vm563_vm13 = vcmp.eq.s32.totalorder %v2651_v4, %v2693_v16  ;;  %vm564_vm14 = vcmp.eq.s32.totalorder %v2654_v5, %v2693_v16  ;;  %p2268_p7 = pnand %p2267_p6, %p3498_p5  ;;  %p2274_p3 = scmp.lt.s32.totalorder %s2272_s13, %s2266_s19 }
  0xa8   : > { %1844 = vmatpush3.bf16.msk.msra.mxu0 %vm1841_vm4, %v2349_v15  ;;  %vm2695_vm8 = vmpackc.low %vm406_vm7, %vm405_vm6  ;;  %vm409_vm0 = vcmp.eq.s32.totalorder %v2704_v18, %v2662_v8  ;;  %vm410_vm1 = vcmp.eq.s32.totalorder %v2707_v19, %v2662_v8  ;;  %vm565_vm4 = vcmp.eq.s32.totalorder %v2665_v9, %v2693_v16  ;;  %v2757_v26 = vadd.s32 96, %v2644_v1 }
  0xa9   : > { %1846 = vmatprep.subr.msk.bf16.mxu0 %vm1845_vm5, %v2349_v15  ;;  %vm2721_vm15 = vmpackc.low %vm408_vm10, %vm407_vm9  ;;  %v2760_v27 = vadd.s32 104, %v2644_v1  ;;  %vm411_vm7 = vcmp.eq.s32.totalorder %v2730_v21, %v2662_v8  ;;  %v2770_v28 = vadd.s32 112, %v2644_v1  ;;  %v2773_v29 = vadd.s32 120, %v2644_v1  ;;  %p2269_p9 = pneg %p2268_p7  ;;  %p2275_p13 = por %p2274_p3, %p2273_p12 }
  0xaa   : > { %vm1873_vm2 = vmpackc.low %vm562_vm12, %vm561_vm11  ;;  %vm567_vm10 = vcmp.eq.s32.totalorder %v2680_v13, %v2693_v16  ;;  %vm568_vm11 = vcmp.eq.s32.totalorder %v2683_v14, %v2693_v16  ;;  %v723_v31 = vsub.s32 2, %v2644_v1  ;;  %v2791_v32 = vrot.slane %v2656_v6, %v1051_v24 }
  0xab   : > { %1874 = vmatprep.subr.msk.bf16.mxu1 %vm1873_vm2, %v2349_v15  ;;  %vm2736_vm3 = vmpackc.low %vm564_vm14, %vm563_vm13  ;;  %vm413_vm13 = vcmp.eq.s32.totalorder %v2757_v26, %v2662_v8  ;;  %vm414_vm14 = vcmp.eq.s32.totalorder %v2760_v27, %v2662_v8  ;;  %v887_v37 = vsub.s32 3, %v2644_v1  ;;  %p2276_p0 = pnand %p2275_p13, %p2269_p9 }
  0xac   : > { %1848 = vmatpush3.bf16.msk.msra.mxu0 %vm1845_vm5, %v2349_v15  ;;  %vm566_vm5 = vcmp.eq.s32.totalorder %v2668_v10, %v2693_v16  ;;  %1876 = vmatpush3.bf16.msk.msra.mxu1 %vm1873_vm2, %v2349_v15  ;;  %vm2752_vm6 = vmpackc.low %vm410_vm1, %vm409_vm0  ;;  %vm416_vm0 = vcmp.eq.s32.totalorder %v2773_v29, %v2662_v8  ;;  %vm569_vm2 = vcmp.eq.s32.totalorder %v2704_v18, %v2693_v16 }
  0xad   : > { %1850 = vmatprep.subr.msk.bf16.mxu0 %vm2695_vm8, %v2349_v15  ;;  %1878 = vmatprep.subr.msk.bf16.mxu1 %vm2736_vm3, %v2349_v15  ;;  %vm2775_vm9 = vmpackc.low %vm566_vm5, %vm565_vm4  ;;  %vm571_vm4 = vcmp.eq.s32.totalorder %v2730_v21, %v2693_v16  ;;  %v2822_v35 = vrot.slane %v2656_v6, %v723_v31  ;;  %vm572_vm5 = vcmp.eq.s32.totalorder %v2733_v22, %v2693_v16 }
  0xae   : > { %vm2811_vm1 = vmpackc.low %vm568_vm11, %vm567_vm10  ;;  %v2927_v41 = vrot.slane %v2656_v6, %v887_v37  ;;  %v742_v6 = vld [vmem:[#allocation8 + $0x8] sm:$0xff] }
  0xaf   : > { %vm728_vm11 = vcmp.eq.s32.totalorder %v2654_v5, %v2822_v35 }
  0xb0   : > { %1852 = vmatpush3.bf16.msk.msra.mxu0 %vm2695_vm8, %v2349_v15  ;;  %vm412_vm8 = vcmp.eq.s32.totalorder %v2733_v22, %v2662_v8  ;;  %1880 = vmatpush3.bf16.msk.msra.mxu1 %vm2736_vm3, %v2349_v15  ;;  %vm570_vm3 = vcmp.eq.s32.totalorder %v2707_v19, %v2693_v16  ;;  %vm889_vm10 = vcmp.eq.s32.totalorder %v2644_v1, %v2927_v41 }
  0xb1   : > { %1854 = vmatprep.subr.msk.bf16.mxu0 %vm2721_vm15, %v2349_v15  ;;  %vm2796_vm12 = vmpackc.low %vm412_vm8, %vm411_vm7  ;;  %1882 = vmatprep.subr.msk.bf16.mxu1 %vm2775_vm9, %v2349_v15  ;;  %vm1054_vm7 = vcmp.eq.s32.totalorder %v2648_v3, %v2791_v32  ;;  %vm576_vm8 = vcmp.eq.s32.totalorder %v2773_v29, %v2693_v16 }
  0xb4   : > { %1856 = vmatpush3.bf16.msk.msra.mxu0 %vm2721_vm15, %v2349_v15  ;;  %vm415_vm15 = vcmp.eq.s32.totalorder %v2770_v28, %v2662_v8  ;;  %1884 = vmatpush3.bf16.msk.msra.mxu1 %vm2775_vm9, %v2349_v15  ;;  %vm890_vm9 = vcmp.eq.s32.totalorder %v2648_v3, %v2927_v41  ;;  %v744_v8 = vld [vmem:[#allocation8 + $0x18] sm:$0xff] }
  0xb5   : > { %1858 = vmatprep.subr.msk.bf16.mxu0 %vm2752_vm6, %v2349_v15  ;;  %1886 = vmatprep.subr.msk.bf16.mxu1 %vm2811_vm1, %v2349_v15 }
  0xb8   : > { %1860 = vmatpush3.bf16.msk.msra.mxu0 %vm2752_vm6, %v2349_v15  ;;  %vm2842_vm6 = vmpackc.low %vm414_vm14, %vm413_vm13  ;;  %1888 = vmatpush3.bf16.msk.msra.mxu1 %vm2811_vm1, %v2349_v15  ;;  %vm573_vm1 = vcmp.eq.s32.totalorder %v2757_v26, %v2693_v16  ;;  %vm725_vm14 = vcmp.eq.s32.totalorder %v2644_v1, %v2822_v35 }
  0xb9   : > { %1862 = vmatprep.subr.msk.bf16.mxu0 %vm2796_vm12, %v2349_v15  ;;  %vm2862_vm13 = vmpackc.low %vm570_vm3, %vm569_vm2  ;;  %vm574_vm2 = vcmp.eq.s32.totalorder %v2760_v27, %v2693_v16  ;;  %vm726_vm3 = vcmp.eq.s32.totalorder %v2648_v3, %v2822_v35 }
  0xba   : > { %1890 = vmatprep.subr.msk.bf16.mxu1 %vm2862_vm13, %v2349_v15 }
  0xbc   : > { %1864 = vmatpush3.bf16.msk.msra.mxu0 %vm2796_vm12, %v2349_v15  ;;  %vm2901_vm12 = vmpackc.low %vm416_vm0, %vm415_vm15  ;;  %vm575_vm0 = vcmp.eq.s32.totalorder %v2770_v28, %v2693_v16  ;;  %1892 = vmatpush3.bf16.msk.msra.mxu1 %vm2862_vm13, %v2349_v15  ;;  %vm729_vm13 = vcmp.eq.s32.totalorder %v2665_v9, %v2822_v35  ;;  %v1072_v16 = vld [vmem:[#allocation11 + $0x18] sm:$0xff] }
  0xbd   : > { %1866 = vmatprep.subr.msk.bf16.mxu0 %vm2842_vm6, %v2349_v15  ;;  %vm2918_vm15 = vmpackc.low %vm572_vm5, %vm571_vm4  ;;  %vm727_vm5 = vcmp.eq.s32.totalorder %v2651_v4, %v2822_v35 }
  0xbe   : > { %vm2939_vm4 = vmpackc.low %vm574_vm2, %vm573_vm1  ;;  %1894 = vmatprep.subr.msk.bf16.mxu1 %vm2918_vm15, %v2349_v15  ;;  %vm730_vm2 = vcmp.eq.s32.totalorder %v2668_v10, %v2822_v35 }
  0xbf   : > { %vm2961_vm1 = vmpackc.low %vm726_vm3, %vm725_vm14 }
  0xc0   : > { %1868 = vmatpush3.bf16.msk.msra.mxu0 %vm2842_vm6, %v2349_v15  ;;  %vm2953_vm6 = vmpackc.low %vm576_vm8, %vm575_vm0  ;;  %vm1053_vm0 = vcmp.eq.s32.totalorder %v2644_v1, %v2791_v32  ;;  %1896 = vmatpush3.bf16.msk.msra.mxu1 %vm2918_vm15, %v2349_v15  ;;  %vm3455_vm15 = vcmp.eq.s32.totalorder %v2654_v5, %v2791_v32  ;;  %v905_v1 = vld [vmem:[#allocation9] sm:$0xff] }
  0xc1   : > { %1870 = vmatprep.subr.msk.bf16.mxu0 %vm2901_vm12, %v2349_v15  ;;  %vm2969_vm8 = vmpackc.low %vm728_vm11, %vm727_vm5  ;;  %1898 = vmatprep.subr.msk.bf16.mxu1 %vm2939_vm4, %v2349_v15 }
  0xc2   : > { %vm2984_vm14 = vmpackc.low %vm730_vm2, %vm729_vm13  ;;  %vm3463_vm13 = vcmp.eq.s32.totalorder %v2683_v14, %v2791_v32 }
  0xc3   : > { %vm2997_vm11 = vmpackc.low %vm890_vm9, %vm889_vm10  ;;  %vm3459_vm9 = vcmp.eq.s32.totalorder %v2668_v10, %v2791_v32 }
  0xc4   : > { %1872 = vmatpush3.bf16.msk.msra.mxu0 %vm2901_vm12, %v2349_v15  ;;  %vm3004_vm3 = vmpackc.low %vm1054_vm7, %vm1053_vm0  ;;  %vm3454_vm12 = vcmp.eq.s32.totalorder %v2651_v4, %v2791_v32  ;;  %1900 = vmatpush3.bf16.msk.msra.mxu1 %vm2939_vm4, %v2349_v15  ;;  %vm3458_vm7 = vcmp.eq.s32.totalorder %v2665_v9, %v2791_v32  ;;  %vm3462_vm4 = vcmp.eq.s32.totalorder %v2680_v13, %v2791_v32 }
  0xc5   : > { %1906 = vmatprep.subr.msk.bf16.mxu0 %vm2961_vm1, %v2349_v15  ;;  %vm3014_vm5 = vmpackc.low %vm3455_vm15, %vm3454_vm12  ;;  %1902 = vmatprep.subr.msk.bf16.mxu1 %vm2953_vm6, %v2349_v15  ;;  %vm3466_vm0 = vcmp.eq.s32.totalorder %v2704_v18, %v2791_v32  ;;  %vm891_vm15 = vcmp.eq.s32.totalorder %v2651_v4, %v2927_v41 }
  0xc6   : > { %vm3030_vm10 = vmpackc.low %vm3459_vm9, %vm3458_vm7  ;;  %vm892_vm7 = vcmp.eq.s32.totalorder %v2654_v5, %v2927_v41  ;;  %vm3470_vm9 = vcmp.eq.s32.totalorder %v2730_v21, %v2791_v32 }
  0xc7   : > { %1684 = vmatmul.mubr.f32.vlgmr.msra.gmra.mrb[0].mxu0 %v418_v46  ;;  %vm3046_vm2 = vmpackc.low %vm3463_vm13, %vm3462_vm4  ;;  %vm3471_vm4 = vcmp.eq.s32.totalorder %v2733_v22, %v2791_v32 }
  0xc8   : > { %1686 = vmatprep.mubr.f32.mxu0 %v419_v48  ;;  %1908 = vmatpush3.bf16.msk.msra.mxu0 %vm2961_vm1, %v2349_v15  ;;  %v3465_v55 = vsel %vm3046_vm2, 4294967295, %v3464_v55  ;;  %vm3467_vm1 = vcmp.eq.s32.totalorder %v2707_v19, %v2791_v32  ;;  %vm3073_vm13 = vmpackc.low %vm3471_vm4, %vm3470_vm9  ;;  %vm3475_vm9 = vcmp.eq.s32.totalorder %v2760_v27, %v2791_v32 }
  0xc9   : > { %1910 = vmatprep.subr.msk.bf16.mxu0 %vm2969_vm8, %v2349_v15  ;;  %vm3059_vm12 = vmpackc.low %vm3467_vm1, %vm3466_vm0  ;;  %v3473_v57 = vsel %vm3073_vm13, 4294967295, %v3472_v57  ;;  %1904 = vmatpush3.bf16.msk.msra.mxu1 %vm2953_vm6, %v2349_v15  ;;  %vm731_vm0 = vcmp.eq.s32.totalorder %v2680_v13, %v2822_v35  ;;  %vm732_vm1 = vcmp.eq.s32.totalorder %v2683_v14, %v2822_v35  ;;  %vm3478_vm6 = vcmp.eq.s32.totalorder %v2770_v28, %v2791_v32 }
  0xca   : > { %v3469_v56 = vsel %vm3059_vm12, 4294967295, %v3468_v56  ;;  %vm3474_vm12 = vcmp.eq.s32.totalorder %v2757_v26, %v2791_v32  ;;  %1938 = vmatprep.subr.msk.bf16.mxu1 %vm2997_vm11, %v2349_v15  ;;  %vm3479_vm13 = vcmp.eq.s32.totalorder %v2773_v29, %v2791_v32 }
  0xcb   : > { %1687 = vmatmul.mubr.f32.gmra.mrb[2].mxu0 %v420_v52  ;;  %vm3090_vm4 = vmpackc.low %vm3475_vm9, %vm3474_vm12  ;;  %vm893_vm9 = vcmp.eq.s32.totalorder %v2665_v9, %v2927_v41  ;;  %v1069_v9 = vld [vmem:[#allocation11] sm:$0xff] }
  0xcc   : > { %1759 = vmatprep.mubr.f32.mxu0 %v741_v54  ;;  %1912 = vmatpush3.bf16.msk.msra.mxu0 %vm2969_vm8, %v2349_v15  ;;  %vm3106_vm2 = vmpackc.low %vm3479_vm13, %vm3478_vm6  ;;  %vm894_vm13 = vcmp.eq.s32.totalorder %v2668_v10, %v2927_v41  ;;  %vm733_vm6 = vcmp.eq.s32.totalorder %v2704_v18, %v2822_v35  ;;  %v906_v10 = vld [vmem:[#allocation9 + $0x8] sm:$0xff] }
  0xcd   : > { %v3481_v61 = vsel %vm3106_vm2, 4294967295, %v3480_v61  ;;  %1914 = vmatprep.subr.msk.bf16.mxu0 %vm2984_vm14, %v2349_v15  ;;  %vm3113_vm12 = vmpackc.low %vm892_vm7, %vm891_vm15  ;;  %1722 = vmatmul.mubr.f32.vlgmr.msra.gmra.mrb[0].mxu1 %v578_v58  ;;  %vm734_vm15 = vcmp.eq.s32.totalorder %v2707_v19, %v2822_v35  ;;  %vm738_vm2 = vcmp.eq.s32.totalorder %v2760_v27, %v2822_v35 }
  0xce   : > { %vm3117_vm8 = vmpackc.low %vm732_vm1, %vm731_vm0  ;;  %1724 = vmatprep.mubr.f32.mxu1 %v579_v60  ;;  %1940 = vmatpush3.bf16.msk.msra.mxu1 %vm2997_vm11, %v2349_v15  ;;  %vm896_vm11 = vcmp.eq.s32.totalorder %v2683_v14, %v2927_v41  ;;  %vm735_vm1 = vcmp.eq.s32.totalorder %v2730_v21, %v2822_v35  ;;  %v1070_v14 = vld [vmem:[#allocation11 + $0x8] sm:$0xff] }
  0xcf   : > { %1942 = vmatprep.subr.msk.bf16.mxu1 %vm3113_vm12, %v2349_v15  ;;  %vm3141_vm7 = vmpackc.low %vm894_vm13, %vm893_vm9  ;;  %vm736_vm9 = vcmp.eq.s32.totalorder %v2733_v22, %v2822_v35 }
  0xd0   : > { %1916 = vmatpush3.bf16.msk.msra.mxu0 %vm2984_vm14, %v2349_v15  ;;  %vm3145_vm0 = vmpackc.low %vm734_vm15, %vm733_vm6  ;;  %vm895_vm14 = vcmp.eq.s32.totalorder %v2680_v13, %v2927_v41  ;;  %vm737_vm15 = vcmp.eq.s32.totalorder %v2757_v26, %v2822_v35  ;;  %v1071_v13 = vld [vmem:[#allocation11 + $0x10] sm:$0xff] }
  0xd1   : > { %1918 = vmatprep.subr.msk.bf16.mxu0 %vm3117_vm8, %v2349_v15  ;;  %1725 = vmatmul.mubr.f32.gmra.mrb[2].mxu1 %v580_v0  ;;  %vm3169_vm13 = vmpackc.low %vm896_vm11, %vm895_vm14 }
  0xd2   : > { %1944 = vmatpush3.bf16.msk.msra.mxu1 %vm3113_vm12, %v2349_v15  ;;  %1797 = vmatprep.mubr.f32.mxu1 %v905_v1  ;;  %vm3173_vm6 = vmpackc.low %vm736_vm9, %vm735_vm1  ;;  %vm897_vm12 = vcmp.eq.s32.totalorder %v2704_v18, %v2927_v41  ;;  %vm899_vm1 = vcmp.eq.s32.totalorder %v2730_v21, %v2927_v41  ;;  %vm739_vm9 = vcmp.eq.s32.totalorder %v2770_v28, %v2822_v35  ;;  %v1211_v18 = vld [vmem:[%s3394_s6 + $0x10] sm:$0xff] }
  0xd3   : > { %1946 = vmatprep.subr.msk.bf16.mxu1 %vm3141_vm7, %v2349_v15  ;;  %vm1929_vm11 = vmpackc.low %vm738_vm2, %vm737_vm15  ;;  %vm902_vm15 = vcmp.eq.s32.totalorder %v2760_v27, %v2927_v41  ;;  %1225 = vperm.xlu1 %2109, %v1211_v18  }
  0xd4   : > { %1920 = vmatpush3.bf16.msk.msra.mxu0 %vm3117_vm8, %v2349_v15  ;;  %vm898_vm8 = vcmp.eq.s32.totalorder %v2707_v19, %v2927_v41  ;;  %v1209_v19 = vld [vmem:[%s3394_s6] sm:$0xff] }
  0xd5   : > { %1922 = vmatprep.subr.msk.bf16.mxu0 %vm3145_vm0, %v2349_v15  ;;  %vm1953_vm14 = vmpackc.low %vm898_vm8, %vm897_vm12  ;;  %vm901_vm8 = vcmp.eq.s32.totalorder %v2757_v26, %v2927_v41  ;;  %1215 = vperm.xlu0 %2108, %v1209_v19  }
  0xd6   : > { %1948 = vmatpush3.bf16.msk.msra.mxu1 %vm3141_vm7, %v2349_v15  ;;  %vm900_vm7 = vcmp.eq.s32.totalorder %v2733_v22, %v2927_v41 }
  0xd7   : > { %1950 = vmatprep.subr.msk.bf16.mxu1 %vm3169_vm13, %v2349_v15  ;;  %vm1957_vm2 = vmpackc.low %vm900_vm7, %vm899_vm1  ;;  %vm904_vm1 = vcmp.eq.s32.totalorder %v2773_v29, %v2927_v41  ;;  %1230 = vperm.xlu1 %2109, %v1212_v20  }
  0xd8   : > { %1924 = vmatpush3.bf16.msk.msra.mxu0 %vm3145_vm0, %v2349_v15  ;;  %vm740_vm0 = vcmp.eq.s32.totalorder %v2773_v29, %v2822_v35 }
  0xd9   : > { %1926 = vmatprep.subr.msk.bf16.mxu0 %vm3173_vm6, %v2349_v15  ;;  %vm1933_vm12 = vmpackc.low %vm740_vm0, %vm739_vm9 }
  0xda   : > { %1952 = vmatpush3.bf16.msk.msra.mxu1 %vm3169_vm13, %v2349_v15  ;;  %vm1961_vm13 = vmpackc.low %vm902_vm15, %vm901_vm8 }
  0xdb   : > { %1954 = vmatprep.subr.msk.bf16.mxu1 %vm1953_vm14, %v2349_v15 }
  0xdc   : > { %1928 = vmatpush3.bf16.msk.msra.mxu0 %vm3173_vm6, %v2349_v15  ;;  %vm903_vm6 = vcmp.eq.s32.totalorder %v2770_v28, %v2927_v41 }
  0xdd   : > { %1930 = vmatprep.subr.msk.bf16.mxu0 %vm1929_vm11, %v2349_v15 }
  0xde   : > { %1956 = vmatpush3.bf16.msk.msra.mxu1 %vm1953_vm14, %v2349_v15  ;;  %vm1965_vm14 = vmpackc.low %vm904_vm1, %vm903_vm6 }
  0xdf   : > { %1958 = vmatprep.subr.msk.bf16.mxu1 %vm1957_vm2, %v2349_v15 }
  0xe0   : > { %1932 = vmatpush3.bf16.msk.msra.mxu0 %vm1929_vm11, %v2349_v15  ;;  %vm3494_vm11 = vnez %v3465_v55 }
  0xe1   : > { %1934 = vmatprep.subr.msk.bf16.mxu0 %vm1933_vm12, %v2349_v15 }
  0xe2   : > { %1960 = vmatpush3.bf16.msk.msra.mxu1 %vm1957_vm2, %v2349_v15 }
  0xe3   : > { %1962 = vmatprep.subr.msk.bf16.mxu1 %vm1961_vm13, %v2349_v15 }
  0xe4   : > { %1936 = vmatpush3.bf16.msk.msra.mxu0 %vm1933_vm12, %v2349_v15 }
  0xe5   : > { %1970 = vmatprep.subr.msk.bf16.mxu0 %vm3004_vm3, %v2349_v15 }
  0xe6   : > { %1964 = vmatpush3.bf16.msk.msra.mxu1 %vm1961_vm13, %v2349_v15 }
  0xe7   : > { %1760 = vmatmul.mubr.f32.vlgmr.msra.gmra.mrb[4].mxu0 %v742_v6  ;;  %1966 = vmatprep.subr.msk.bf16.mxu1 %vm1965_vm14, %v2349_v15 }
  0xe8   : > { %1762 = vmatprep.mubr.f32.mxu0 %v743_v7  ;;  %1972 = vmatpush3.bf16.msk.msra.mxu0 %vm3004_vm3, %v2349_v15 }
  0xe9   : > { %1974 = vmatprep.subr.msk.bf16.mxu0 %vm3014_vm5, %v2349_v15 }
  0xea   : > { %1968 = vmatpush3.bf16.msk.msra.mxu1 %vm1965_vm14, %v2349_v15 }
  0xeb   : > { %1763 = vmatmul.mubr.f32.gmra.mrb[6].mxu0 %v744_v8  ;;  %2001 = vmatprep.subr.msk.bf16.mxu1 %vm3004_vm3, %v2349_v15 }
  0xec   : > { %1835 = vmatprep.mubr.f32.mxu0 %v1069_v9  ;;  %1976 = vmatpush3.bf16.msk.msra.mxu0 %vm3014_vm5, %v2349_v15 }
  0xed   : > { %1798 = vmatmul.mubr.f32.vlgmr.msra.gmra.mrb[4].mxu1 %v906_v10  ;;  %1978 = vmatprep.subr.msk.bf16.mxu0 %vm3030_vm10, %v2349_v15 }
  0xee   : > { %1800 = vmatprep.mubr.f32.mxu1 %v907_v11  ;;  %2009 = vmatpush3.bf16.msk.msra.mxu1 %vm3004_vm3, %v2349_v15  ;;  %vm3495_vm3 = vnez %v3469_v56 }
  0xef   : > { %2002 = vmatprep.subr.msk.bf16.mxu1 %vm3014_vm5, %v2349_v15 }
  0xf0   : > { %1980 = vmatpush3.bf16.msk.msra.mxu0 %vm3030_vm10, %v2349_v15 }
  0xf1   : > { %1801 = vmatmul.mubr.f32.gmra.mrb[6].mxu1 %v908_v12  ;;  %1982 = vmatprep.subr.msk.bf16.mxu0 %vm3494_vm11, %v2349_v15 }
  0xf2   : > { %2010 = vmatpush3.bf16.msk.msra.mxu1 %vm3014_vm5, %v2349_v15  ;;  %1838 = vmatprep.mubr.f32.mxu1 %v1071_v13  ;;  %vm3496_vm5 = vnez %v3473_v57 }
  0xf3   : > { %2003 = vmatprep.subr.msk.bf16.mxu1 %vm3030_vm10, %v2349_v15 }
  0xf4   : > { %1984 = vmatpush3.bf16.msk.msra.mxu0 %vm3494_vm11, %v2349_v15 }
  0xf5   : > { %1986 = vmatprep.subr.msk.bf16.mxu0 %vm3495_vm3, %v2349_v15 }
  0xf6   : > { %2011 = vmatpush3.bf16.msk.msra.mxu1 %vm3030_vm10, %v2349_v15  ;;  %vm3497_vm10 = vnez %v3481_v61 }
  0xf7   : > { %2004 = vmatprep.subr.msk.bf16.mxu1 %vm3494_vm11, %v2349_v15 }
  0xf8   : > { %1988 = vmatpush3.bf16.msk.msra.mxu0 %vm3495_vm3, %v2349_v15 }
  0xf9   : > { %1990 = vmatprep.subr.msk.bf16.mxu0 %vm3496_vm5, %v2349_v15 }
  0xfa   : > { %2012 = vmatpush3.bf16.msk.msra.mxu1 %vm3494_vm11, %v2349_v15 }
  0xfb   : > { %2005 = vmatprep.subr.msk.bf16.mxu1 %vm3495_vm3, %v2349_v15 }
  0xfc   : > { %1992 = vmatpush3.bf16.msk.msra.mxu0 %vm3496_vm5, %v2349_v15 }
  0xfd   : > { %1994 = vmatprep.subr.msk.bf16.mxu0 %vm3090_vm4, %v2349_v15 }
  0xfe   : > { %2013 = vmatpush3.bf16.msk.msra.mxu1 %vm3495_vm3, %v2349_v15 }
  0xff   : > { %2006 = vmatprep.subr.msk.bf16.mxu1 %vm3496_vm5, %v2349_v15 }
 0x100   : > { %1996 = vmatpush3.bf16.msk.msra.mxu0 %vm3090_vm4, %v2349_v15 }
 0x101   : > { %1998 = vmatprep.subr.msk.bf16.mxu0 %vm3497_vm10, %v2349_v15 }
 0x102   : > { %2014 = vmatpush3.bf16.msk.msra.mxu1 %vm3496_vm5, %v2349_v15 }
 0x103   : > { %2007 = vmatprep.subr.msk.bf16.mxu1 %vm3090_vm4, %v2349_v15 }
 0x104   : > { %2000 = vmatpush3.bf16.msk.msra.mxu0 %vm3497_vm10, %v2349_v15 }
 0x106   : > { %2015 = vmatpush3.bf16.msk.msra.mxu1 %vm3090_vm4, %v2349_v15 }
 0x107   : > { %2008 = vmatprep.subr.msk.bf16.mxu1 %vm3497_vm10, %v2349_v15  ;;  %1836 = vmatmul.mubr.f32.vlgmr.msra.gmra.mrb[8].mxu0 %v1070_v14 }
 0x10a   : > { %2016 = vmatpush3.bf16.msk.msra.mxu1 %vm3497_vm10, %v2349_v15  ;;  %v1210_v15 = vld [vmem:[%s3394_s6 + $0x8] sm:$0xff] }
 0x10b   : > { %1220 = vperm.xlu0 %2108, %v1210_v15  }
 0x10d   : > { %1839 = vmatmul.mubr.f32.vlgmr.msra.gmra.mrb[8].mxu1 %v1072_v16 }
 0x19a   : > { %v1685_v21 = vpop.f32.mrb[0].mxu0 }
 0x19b   : > { %v539_v22 = vmul.f32 %v1685_v21, %v1685_v21  ;;  %v519_v23 = vpop.f32.mrb[1].mxu0 }
 0x19c   : > { %v538_v24 = vmul.f32 %v519_v23, %v519_v23 }
 0x19e   : > { %v542_v25 = vadd.f32 %v539_v22, %v538_v24  ;;  %v1688_v26 = vpop.f32.mrb[2].mxu0 }
 0x19f   : > { %v529_v27 = vpop.f32.mrb[3].mxu0  ;;  %v541_v29 = vmul.f32 %v1688_v26, %v1688_v26 }
 0x1a0   : > { %v540_v28 = vmul.f32 %v529_v27, %v529_v27  ;;  %v1723_v31 = vpop.f32.mrb[0].mxu1 }
 0x1a1   : > { %v679_v32 = vpop.f32.mrb[1].mxu1 }
 0x1a2   : > { %v543_v30 = vadd.f32 %v542_v25, %v540_v28 }
 0x1a4   : > { %v544_v33 = vadd.f32 %v543_v30, %v541_v29  ;;  %v1726_v35 = vpop.f32.mrb[2].mxu1 }
 0x1a5   : > { %v689_v36 = vpop.f32.mrb[3].mxu1 }
 0x1a6   : > { %v545_v34 = vrot.slane %v544_v33, 4 }
 0x1a8   : > { %v546_v37 = vadd.f32 %v545_v34, %v544_v33 }
 0x1aa   : > { %v547_v38 = vrot.slane %v546_v37, 2 }
 0x1ac   : > { %v548_v39 = vadd.f32 %v547_v38, %v546_v37 }
 0x1ae   : > { %v549_v40 = vrot.slane %v548_v39, 1 }
 0x1b0   : > { %v550_v41 = vadd.f32 %v549_v40, %v548_v39 }
 0x1b2   : > { %v551_v42 = vmax.f32 %v550_v41, 1e-24 }
 0x1b4   : > { %2110 = vrsqrt.f32 %v551_v42 }
 0x1ba   : > { %v1761_v43 = vpop.f32.mrb[4].mxu0 }
 0x1bb   : > { %v843_v44 = vpop.f32.mrb[5].mxu0 }
 0x1be   : > { %v2111_v45 = vpop.eup %2110  ;;  %v1764_v50 = vpop.f32.mrb[6].mxu0 }
 0x1bf   : > { %v555_v46 = vmul.f32 %v2111_v45, %v529_v27  ;;  %v554_v47 = vmul.f32 %v2111_v45, %v1685_v21  ;;  %v553_v48 = vmul.f32 %v2111_v45, %v519_v23  ;;  %v556_v49 = vmul.f32 %v2111_v45, %v1688_v26  ;;  %v853_v51 = vpop.f32.mrb[7].mxu0 }
 0x1c0   : > { %v1799_v56 = vpop.f32.mrb[4].mxu1 }
 0x1c1   : > { %v699_v52 = vadd.f32 %v1723_v31, %v554_v47  ;;  %v698_v53 = vadd.f32 %v679_v32, %v553_v48  ;;  %v701_v54 = vadd.f32 %v1726_v35, %v556_v49  ;;  %v700_v55 = vadd.f32 %v689_v36, %v555_v46  ;;  %v1007_v59 = vpop.f32.mrb[5].mxu1 }
 0x1c3   : > { %v703_v57 = vmul.f32 %v699_v52, %v699_v52  ;;  %v702_v58 = vmul.f32 %v698_v53, %v698_v53  ;;  %v704_v61 = vmul.f32 %v700_v55, %v700_v55  ;;  %v705_v63 = vmul.f32 %v701_v54, %v701_v54 }
 0x1c4   : > { %v1802_v62 = vpop.f32.mrb[6].mxu1 }
 0x1c5   : > { %v706_v60 = vadd.f32 %v703_v57, %v702_v58  ;;  %v1017_v1 = vpop.f32.mrb[7].mxu1 }
 0x1c7   : > { %v707_v0 = vadd.f32 %v706_v60, %v704_v61 }
 0x1c9   : > { %v708_v2 = vadd.f32 %v707_v0, %v705_v63  ;;  %v1216_v63 = vpop.permute.xlu0 %1215 }
 0x1cb   : > { %v709_v3 = vrot.slane %v708_v2, 4 }
 0x1cd   : > { %v710_v4 = vadd.f32 %v709_v3, %v708_v2 }
 0x1cf   : > { %v711_v5 = vrot.slane %v710_v4, 2 }
 0x1d1   : > { %v712_v6 = vadd.f32 %v711_v5, %v710_v4 }
 0x1d3   : > { %v713_v7 = vrot.slane %v712_v6, 1 }
 0x1d5   : > { %v714_v8 = vadd.f32 %v713_v7, %v712_v6  ;;  %v1221_v7 = vpop.permute.xlu0 %1220 }
 0x1d7   : > { %v715_v9 = vmax.f32 %v714_v8, 1e-24 }
 0x1d9   : > { %2112 = vrsqrt.f32 %v715_v9 }
 0x1da   : > { %v1837_v10 = vpop.f32.mrb[8].mxu0 }
 0x1db   : > { %v1171_v11 = vpop.f32.mrb[9].mxu0 }
 0x1e0   : > { %v1840_v12 = vpop.f32.mrb[8].mxu1 }
 0x1e1   : > { %v1181_v14 = vpop.f32.mrb[9].mxu1 }
 0x1e3   : > { %v2113_v13 = vpop.eup %2112 }
 0x1e4   : > { %v718_v16 = vmul.f32 %v2113_v13, %v699_v52  ;;  %v717_v17 = vmul.f32 %v2113_v13, %v698_v53  ;;  %v720_v18 = vmul.f32 %v2113_v13, %v701_v54  ;;  %v719_v19 = vmul.f32 %v2113_v13, %v700_v55 }
 0x1e6   : > { %v863_v20 = vadd.f32 %v1761_v43, %v718_v16  ;;  %v862_v15 = vadd.f32 %v843_v44, %v717_v17  ;;  %v865_v21 = vadd.f32 %v1764_v50, %v720_v18  ;;  %v864_v22 = vadd.f32 %v853_v51, %v719_v19 }
 0x1e8   : > { %v867_v23 = vmul.f32 %v863_v20, %v863_v20  ;;  %v866_v24 = vmul.f32 %v862_v15, %v862_v15  ;;  %v868_v26 = vmul.f32 %v864_v22, %v864_v22  ;;  %v869_v27 = vmul.f32 %v865_v21, %v865_v21 }
 0x1ea   : > { %v870_v25 = vadd.f32 %v867_v23, %v866_v24 }
 0x1ec   : > { %v871_v28 = vadd.f32 %v870_v25, %v868_v26 }
 0x1ee   : > { %v872_v29 = vadd.f32 %v871_v28, %v869_v27 }
 0x1f0   : > { %v873_v30 = vrot.slane %v872_v29, 4 }
 0x1f2   : > { %v874_v31 = vadd.f32 %v873_v30, %v872_v29 }
 0x1f4   : > { %v875_v32 = vrot.slane %v874_v31, 2 }
 0x1f6   : > { %v876_v33 = vadd.f32 %v875_v32, %v874_v31 }
 0x1f8   : > { %v877_v34 = vrot.slane %v876_v33, 1 }
 0x1fa   : > { %v878_v35 = vadd.f32 %v877_v34, %v876_v33 }
 0x1fc   : > { %v879_v36 = vmax.f32 %v878_v35, 1e-24 }
 0x1fe   : > { %2114 = vrsqrt.f32 %v879_v36 }
 0x208   : > { %v2115_v37 = vpop.eup %2114 }
 0x209   : > { %v882_v38 = vmul.f32 %v2115_v37, %v863_v20  ;;  %v881_v39 = vmul.f32 %v2115_v37, %v862_v15  ;;  %v884_v40 = vmul.f32 %v2115_v37, %v865_v21  ;;  %v883_v41 = vmul.f32 %v2115_v37, %v864_v22 }
 0x20a   : > { %v1248_v37 = vstv %s1247_s26 }
 0x20b   : > { %v1027_v42 = vadd.f32 %v1799_v56, %v882_v38  ;;  %v1026_v43 = vadd.f32 %v1007_v59, %v881_v39  ;;  %v1029_v44 = vadd.f32 %v1802_v62, %v884_v40  ;;  %v1028_v45 = vadd.f32 %v1017_v1, %v883_v41  ;;  %v1226_v59 = vpop.permute.xlu1 %1225 }
 0x20d   : > { %v1031_v46 = vmul.f32 %v1027_v42, %v1027_v42  ;;  %v1030_v47 = vmul.f32 %v1026_v43, %v1026_v43  ;;  %v1032_v49 = vmul.f32 %v1028_v45, %v1028_v45  ;;  %v1033_v50 = vmul.f32 %v1029_v44, %v1029_v44 }
 0x20f   : > { %v1034_v48 = vadd.f32 %v1031_v46, %v1030_v47  ;;  %v1231_v19 = vpop.permute.xlu1 %1230 }
 0x211   : > { %v1035_v51 = vadd.f32 %v1034_v48, %v1032_v49 }
 0x213   : > { %v1036_v52 = vadd.f32 %v1035_v51, %v1033_v50 }
 0x215   : > { %v1037_v53 = vrot.slane %v1036_v52, 4 }
 0x217   : > { %v1038_v54 = vadd.f32 %v1037_v53, %v1036_v52 }
 0x219   : > { %v1039_v55 = vrot.slane %v1038_v54, 2 }
 0x21b   : > { %v1040_v57 = vadd.f32 %v1039_v55, %v1038_v54 }
 0x21d   : > { %v1041_v58 = vrot.slane %v1040_v57, 1 }
 0x21f   : > { %v1042_v60 = vadd.f32 %v1041_v58, %v1040_v57 }
 0x221   : > { %v1043_v61 = vmax.f32 %v1042_v60, 1e-24 }
 0x223   : > { %2116 = vrsqrt.f32 %v1043_v61 }
 0x22d   : > { %v2117_v56 = vpop.eup %2116 }
 0x22e   : > { %v1046_v62 = vmul.f32 %v2117_v56, %v1027_v42  ;;  %v1045_v0 = vmul.f32 %v2117_v56, %v1026_v43  ;;  %v1048_v1 = vmul.f32 %v2117_v56, %v1029_v44  ;;  %v1047_v2 = vmul.f32 %v2117_v56, %v1028_v45 }
 0x230   : > { %v1191_v3 = vadd.f32 %v1837_v10, %v1046_v62  ;;  %v1190_v4 = vadd.f32 %v1171_v11, %v1045_v0  ;;  %v1193_v5 = vadd.f32 %v1840_v12, %v1048_v1  ;;  %v1192_v6 = vadd.f32 %v1181_v14, %v1047_v2 }
 0x232   : > { %v1195_v8 = vmul.f32 %v1191_v3, %v1191_v3  ;;  %v1194_v9 = vmul.f32 %v1190_v4, %v1190_v4  ;;  %v1233_v13 = vmul.f32 %v1216_v63, %v1190_v4  ;;  %v1234_v16 = vmul.f32 %v1221_v7, %v1191_v3 }
 0x233   : > { %v1196_v18 = vmul.f32 %v1192_v6, %v1192_v6  ;;  %v1235_v20 = vmul.f32 %v1226_v59, %v1192_v6  ;;  %v1197_v21 = vmul.f32 %v1193_v5, %v1193_v5  ;;  %v1236_v23 = vmul.f32 %v1231_v19, %v1193_v5 }
 0x234   : > { %v1198_v17 = vadd.f32 %v1195_v8, %v1194_v9  ;;  %v1237_v15 = vadd.f32 %v1234_v16, %v1233_v13 }
 0x236   : > { %v1199_v22 = vadd.f32 %v1198_v17, %v1196_v18  ;;  %v1238_v24 = vadd.f32 %v1237_v15, %v1235_v20 }
 0x238   : > { %v1200_v25 = vadd.f32 %v1199_v22, %v1197_v21  ;;  %v1239_v26 = vadd.f32 %v1238_v24, %v1236_v23 }
 0x23a   : > { %v1201_v10 = vrot.slane %v1200_v25, 4  ;;  %v1240_v12 = vrot.slane %v1239_v26, 4 }
 0x23c   : > { %v1202_v11 = vadd.f32 %v1201_v10, %v1200_v25  ;;  %v1241_v28 = vadd.f32 %v1240_v12, %v1239_v26 }
 0x23e   : > { %v1203_v14 = vrot.slane %v1202_v11, 2  ;;  %v1242_v31 = vrot.slane %v1241_v28, 2 }
 0x240   : > { %v1204_v27 = vadd.f32 %v1203_v14, %v1202_v11  ;;  %v1243_v33 = vadd.f32 %v1242_v31, %v1241_v28 }
 0x242   : > { %v1205_v29 = vrot.slane %v1204_v27, 1  ;;  %v1244_v34 = vrot.slane %v1243_v33, 1 }
 0x244   : > { %v1206_v30 = vadd.f32 %v1205_v29, %v1204_v27  ;;  %v1245_v35 = vadd.f32 %v1244_v34, %v1243_v33 }
 0x246   : > { %v1207_v32 = vmax.f32 %v1206_v30, 1e-24 }
 0x248   : > { %2118 = vrsqrt.f32 %v1207_v32 }
 0x252   : > { %v2119_v36 = vpop.eup %2118 }
 0x253   : > { %v1246_v38 = vmul.f32 %v2119_v36, %v1245_v35 }
 0x255   : > { %v1249_v39 = vadd.f32 %v1248_v37, %v1246_v38 }
 0x257   : > { %v1250_v40 = vsub.f32 0.0, %v1249_v39 }
 0x259   : > { %v1251_v41 = vmul.f32 1.442695, %v1250_v40 }
 0x25b   : > { %2120 = vpow2.f32 %v1251_v41 }
 0x265   : > { %v2121_v42 = vpop.eup %2120 }
 0x266   : > { %v1253_v43 = vadd.f32 1.0, %v2121_v42 }
 0x268   : > { %2122 = vrcp.f32 %v1253_v43 }
 0x272   : > { %v2123_v44 = vpop.eup %2122 }
 0x273   : > { %1255 = vst [vmem:[%s378_s11] sm:$0x1] %v2123_v44 }
 0x274   : > { %2279 = shalt.err (!%p2276_p0)
}
 0x275   : > { %s2280_s27 = scalar_lea.hbm %s3344_s22, 16  ;;  %s2284_s26 = scalar_lea.hbm %s3396_s8, 32 }
 0x276   : > { %p2281_p2 = scmp.ne.s32.totalorder %s3344_s22, %s2280_s27  ;;  %p2285_p10 = scmp.lt.u32.totalorder %s3344_s22, %s3396_s8 }
 0x277   : > { %p2286_p11 = scmp.lt.u32.totalorder %s2284_s26, %s2280_s27  ;;  %p2288_p6 = scmp.lt.u32.totalorder %s2280_s27, %s3344_s22 }
 0x278   : > { %p2282_p8 = pnand %p2281_p2, %p3498_p5 }
 0x279   : > { %p2287_p1 = por %p2286_p11, %p2285_p10 }
 0x27a   : > { %p2283_p4 = pneg %p2282_p8 }
 0x27b   : > { %p2289_p7 = por %p2288_p6, %p2287_p1 }
 0x27d   : > { %p2290_p9 = pnand %p2289_p7, %p2283_p4 }
 0x27f   : > { %2293 = shalt.err (!%p2290_p9)
}
 0x280   : > { %2035 = dma.vmem_to_hbm [thread:$0]  (%p3498_p5), %s3346_s7, 16, %s3344_s22, %s1257_s23  }
 0x281 PF: > { %s1281_s15 = sand.u32 1, %s2328_s29   ;;  %p3499_p12 = scmp.ne.s32.totalorder %s3411_s20, 0 }
 0x282   : > { %p3500_p3 = scmp.ge.s32.totalorder %s2340_s10, 2  ;;  %s1282_s21 = scalar_lea.sflag [#allocation5], %s1281_s15 }
 0x284   : > { %p2055_p13 = pnand %p3500_p3, %p3499_p12 }
 0x286   : > { %2323 = dma.done.wait (!%p2055_p13), %s1282_s21, 16  }
 0x287   : > { %2325 = vsyncadd (!%p2055_p13), %s1282_s21, 4294967280  ;;  %p24_p0 = scmp.ge.s32.totalorder %s2552_s24, 4   ;;  %s3501_s29 = smov %s2332_s30 }
 0x288   : > { %s3502_s30 = smov %s2336_s9  ;;  %s3503_s9 = smov %s2563_s17 }
 0x289   : > { %s3504_s10 = smov %s2552_s24  ;;  %26 = sbr.rel (!%p24_p0) target bundleno = 9 (0x9), region = 113 }
 0x290   :  { %1286 = vsyncpa [#allocation4], 1 }
 0x291   :  { %1288 = vsyncpa [#allocation4 + $0x1], 1 }
 0x292   :  { %1289 = vsyncpa [#allocation7], 1 }
 0x293   :  { %1290 = vsyncpa [#allocation10], 1 }
 0x294   :  { %1291 = vsyncpa [#allocation5], 1 }
 0x295   :  { %1293 = vsyncpa [#allocation5 + $0x1], 1 }

</bundles_post_ra>
